<compile_context>
chip_gen: v6e
topology: v6e:2x2x1
jax: 0.10.0
libtpu: 0.0.40
codegen_flags: <defaults>
</compile_context>

<pallas_src>
import functools

import jax
import jax.numpy as jnp
from jax.experimental import pallas as pl
from jax.experimental.pallas import tpu as pltpu

EPS = 1e-15
LANES = 128  # lane-dense output width


# ---------------------------------------------------------------------------
# Fused multi-graph kernel
# ---------------------------------------------------------------------------
def _net_kernel(nodes_ref,                      # SMEM (B,) int32, scalar-prefetched
                x_ref, adj_ref,                 # (G,N,C) bf16, (G,N,N) bf16
                w1r, w1o, b1, w2r, w2o, b2, wpr, wpo, bp,
                w3r, w3o, b3, w4r, w4o, b4, wc, bc,
                logits_ref, loss_ref):
    G, N, _ = x_ref.shape

    # ---- valid-node mask rebuilt from per-graph node counts ----
    base = pl.program_id(0) * G
    g_iota = jax.lax.broadcasted_iota(jnp.int32, (G, N, 1), 0)
    n_iota = jax.lax.broadcasted_iota(jnp.int32, (G, N, 1), 1)
    limit = jnp.zeros((G, N, 1), jnp.int32)
    for g in range(G):                           # G is small & static
        limit = jnp.where(g_iota == g, nodes_ref[base + g], limit)
    mask = (n_iota < limit).astype(jnp.float32)  # (G, N, 1)

    adj_bf = adj_ref[...]                        # bf16 (0/1 entries are exact)
    adj_f = adj_bf.astype(jnp.float32)
    x0 = x_ref[...]                              # (G, N, C) bf16

    deg = jnp.sum(adj_f, axis=2, keepdims=True)                       # (G, N, 1)
    inv_deg = pl.reciprocal(jnp.maximum(deg, 1.0), approx=True)

    def _sum_nk(t):
        # sum over the node/cluster axes, keep (G, 1, 1)
        return jnp.sum(jnp.sum(t, axis=2, keepdims=True), axis=1, keepdims=True)

    def sage(x_in, a_bf, a_inv_deg, wr, wo, b, *, relu, msk):
        # DenseSAGEConv: ((adj @ x) / clamp(deg,1)) @ W_rel + x @ W_root + b
        g_, m_, c_ = x_in.shape
        x_bf = x_in.astype(jnp.bfloat16)
        agg = jnp.einsum("gij,gjc->gic", a_bf, x_bf,
                         preferred_element_type=jnp.float32) * a_inv_deg
        h = (jnp.dot(agg.astype(jnp.bfloat16).reshape(g_ * m_, c_), wr[...],
                     preferred_element_type=jnp.float32)
             + jnp.dot(x_bf.reshape(g_ * m_, c_), wo[...],
                       preferred_element_type=jnp.float32)
             + b[...])
        h = h.reshape(g_, m_, -1)
        if msk is not None:
            h = h * msk
        if relu:
            h = jnp.maximum(h, 0.0)
        return h

    x1 = sage(x0, adj_bf, inv_deg, w1r, w1o, b1, relu=True, msk=mask)
    x2 = sage(x1, adj_bf, inv_deg, w2r, w2o, b2, relu=True, msk=mask)
    s_logits = sage(x2, adj_bf, inv_deg, wpr, wpo, bp, relu=False, msk=mask)

    # ---- dense_diff_pool ----
    s = jax.nn.softmax(s_logits, axis=-1)
    sm = s * mask                                # (G, N, K) f32
    xm = x2 * mask
    sm_bf = sm.astype(jnp.bfloat16)
    xm_bf = xm.astype(jnp.bfloat16)

    x_pool = jnp.einsum("gnk,gnc->gkc", sm_bf, xm_bf,
                        preferred_element_type=jnp.float32)           # (G, K, H)
    a_s = jnp.einsum("gij,gjk->gik", adj_bf, sm_bf,
                     preferred_element_type=jnp.float32)              # (G, N, K)
    adj_pool = jnp.einsum("gnk,gnl->gkl", sm_bf, a_s.astype(jnp.bfloat16),
                          preferred_element_type=jnp.float32)         # (G, K, K)
    sts = jnp.einsum("gnk,gnl->gkl", sm_bf, sm_bf,
                     preferred_element_type=jnp.float32)              # (G, K, K)

    # ||A - S S^T||_F^2 = sum(A^2) - 2 tr(S^T A S) + sum((S^T S)^2);
    # tr(S^T A S) = sum(S * (A S)). Clamp per graph against f32 cancellation.
    a2 = _sum_nk(adj_f * adj_f)
    tr_sas = _sum_nk(sm * a_s)
    sts2 = _sum_nk(sts * sts)
    link_sq = jnp.maximum(a2 - 2.0 * tr_sas + sts2, 0.0)              # (G, 1, 1)
    ent = _sum_nk(-sm * jnp.log(sm + EPS))                            # (G, 1, 1)

    deg_p = jnp.sum(adj_pool, axis=2, keepdims=True)
    inv_deg_p = pl.reciprocal(jnp.maximum(deg_p, 1.0), approx=True)
    adj_p_bf = adj_pool.astype(jnp.bfloat16)

    x3 = sage(x_pool, adj_p_bf, inv_deg_p, w3r, w3o, b3, relu=True, msk=None)
    x4 = sage(x3, adj_p_bf, inv_deg_p, w4r, w4o, b4, relu=True, msk=None)

    # ---- mean readout + classifier (weights lane-padded to 128 in the wrapper) ----
    x_mean = jnp.mean(x4, axis=1)                                     # (G, 2H)
    logits = (jnp.dot(x_mean.astype(jnp.bfloat16), wc[...],
                      preferred_element_type=jnp.float32) + bc[...])  # (G, LANES)
    logits_ref[0] = logits

    lane = jax.lax.broadcasted_iota(jnp.int32, (1, LANES), 1)
    loss_ref[0] = (jnp.where(lane == 0, jnp.sum(link_sq), 0.0)
                   + jnp.where(lane == 1, jnp.sum(ent), 0.0))


# ---------------------------------------------------------------------------
# Wrapper: weight prep + single pallas_call + loss finalization
# ---------------------------------------------------------------------------
def _pick_graphs_per_step(batch, n, c, vmem_budget_bytes=12 * 1024 * 1024):
    # double-buffered bf16 x + adj per graph
    per_graph = 2 * 2 * (n * n + n * c)
    gmax = max(1, min(batch, 32, vmem_budget_bytes // max(per_graph, 1)))
    for g in range(gmax, 0, -1):
        if batch % g == 0:
            return g
    return 1


def net_forward(params, x, adj, num_nodes, *, graphs_per_step=None):
    # TODO(synk): to_dense_batch / to_dense_adj (sparse edge_index -> dense batching)
    # are host-side data prep; this forward consumes dense x/adj + per-graph node counts.
    B, N, C = x.shape
    p = params
    F_in = p["cls_w"].shape[0]
    NC = p["cls_w"].shape[1]

    G = graphs_per_step if graphs_per_step is not None else _pick_graphs_per_step(B, N, C)
    assert B % G == 0, "batch must be divisible by graphs_per_step"

    x_bf = x.astype(jnp.bfloat16)
    adj_bf = adj.astype(jnp.bfloat16)
    nodes = num_nodes.astype(jnp.int32)

    def sw(name):
        q = p[name]
        return (q["w_rel"].astype(jnp.bfloat16),
                q["w_root"].astype(jnp.bfloat16),
                q["b"].astype(jnp.float32))

    wc = jnp.zeros((F_in, LANES), jnp.bfloat16).at[:, :NC].set(
        p["cls_w"].astype(jnp.bfloat16))
    bc = jnp.zeros((1, LANES), jnp.float32).at[:, :NC].set(p["cls_b"])

    weights = (*sw("gcn_1"), *sw("gcn_2"), *sw("pool"),
               *sw("gcn_3"), *sw("gcn_4"), wc, bc)

    in_specs = ([pl.BlockSpec((G, N, C), lambda i, nref: (i, 0, 0)),
                 pl.BlockSpec((G, N, N), lambda i, nref: (i, 0, 0))]
                + [pl.BlockSpec(w.shape, lambda i, nref: (0, 0)) for w in weights])

    out_shape = (jax.ShapeDtypeStruct((B // G, G, LANES), jnp.float32),
                 jax.ShapeDtypeStruct((B // G, 1, LANES), jnp.float32))
    out_specs = (pl.BlockSpec((1, G, LANES), lambda i, nref: (i, 0, 0)),
                 pl.BlockSpec((1, 1, LANES), lambda i, nref: (i, 0, 0)))

    grid_spec = pltpu.PrefetchScalarGridSpec(
        num_scalar_prefetch=1,
        grid=(B // G,),
        in_specs=in_specs,
        out_specs=out_specs,
    )

    logits_slab, loss_slab = pl.pallas_call(
        _net_kernel,
        out_shape=out_shape,
        grid_spec=grid_spec,
        compiler_params=pltpu.CompilerParams(
            dimension_semantics=("parallel",),
            vmem_limit_bytes=32 * 1024 * 1024,
        ),
    )(nodes, x_bf, adj_bf, *weights)

    logits = logits_slab.reshape(B, LANES)[:, :NC]
    # torch.norm(p=2) over whole [B,N,N] link tensor, then / adj.numel()
    link_total = jnp.maximum(jnp.sum(loss_slab[:, 0, 0]), 0.0)
    l_lp = jnp.sqrt(link_total) / float(B * N * N)
    # (-s*log(s+eps)).sum(-1).mean() over padded [B, N]
    l_e = jnp.sum(loss_slab[:, 0, 1]) / float(B * N)
    return logits, l_lp, l_e


# ---------------------------------------------------------------------------
# Parameters
# ---------------------------------------------------------------------------
def make_sage_params(key, c_in, c_out, scale=0.1):
    k1, k2, k3 = jax.random.split(key, 3)
    return {
        "w_rel": scale * jax.random.normal(k1, (c_in, c_out), jnp.float32),
        "w_root": scale * jax.random.normal(k2, (c_in, c_out), jnp.float32),
        "b": scale * jax.random.normal(k3, (1, c_out), jnp.float32),
    }


def init_net_params(key, in_channel, hidden, nc, max_nodes):
    k = int(0.25 * max_nodes)
    keys = jax.random.split(key, 7)
    return {
        "gcn_1": make_sage_params(keys[0], in_channel, hidden),
        "gcn_2": make_sage_params(keys[1], hidden, hidden),
        "pool": make_sage_params(keys[2], hidden, k),
        "gcn_3": make_sage_params(keys[3], hidden, 2 * hidden),
        "gcn_4": make_sage_params(keys[4], 2 * hidden, 2 * hidden),
        "cls_w": 0.1 * jax.random.normal(keys[5], (2 * hidden, nc), jnp.float32),
        "cls_b": 0.1 * jax.random.normal(keys[6], (1, nc), jnp.float32),
    }


if __name__ == "__main__":
    B, N, C_IN, HIDDEN, NC = 8, 16, 4, 32, 3
    MAX_NODES = N

    key = jax.random.PRNGKey(0)
    k_x, k_a, k_p = jax.random.split(key, 3)

    # Dense batched graphs with varying valid-node counts.
    num_nodes = jnp.array([16, 12, 16, 9, 14, 16, 11, 13], dtype=jnp.int32)
    mask2d = (jnp.arange(N)[None, :] < num_nodes[:, None]).astype(jnp.float32)  # (B, N)

    x = jax.random.normal(k_x, (B, N, C_IN), jnp.float32) * mask2d[:, :, None]
    a = jax.random.bernoulli(k_a, 0.3, (B, N, N)).astype(jnp.float32)
    adj = jnp.maximum(a, jnp.transpose(a, (0, 2, 1)))
    adj = adj * mask2d[:, :, None] * mask2d[:, None, :]

    params = init_net_params(k_p, C_IN, HIDDEN, NC, MAX_NODES)

    fwd = jax.jit(functools.partial(net_forward, graphs_per_step=4))  # grid = (2,)
    logits, l_lp, l_e = fwd(params, x, adj, num_nodes)
    jax.block_until_ready((logits, l_lp, l_e))

    assert logits.shape == (B, NC)
    assert l_lp.shape == () and l_e.shape == ()
    assert bool(jnp.all(jnp.isfinite(logits)))
    assert bool(jnp.isfinite(l_lp)) and bool(jnp.isfinite(l_e))
    print("KERNEL_OK")
</pallas_src>

<mosaic_0001>
module attributes {stable_mosaic.version = 11 : i64} {
  func.func @_net_kernel(%arg0: i32, %arg1: memref<8xi32, #tpu.memory_space<smem>>, %arg2: memref<4x16x4xbf16, #tpu.memory_space<vmem>>, %arg3: memref<4x16x16xbf16, #tpu.memory_space<vmem>>, %arg4: memref<4x32xbf16, #tpu.memory_space<vmem>>, %arg5: memref<4x32xbf16, #tpu.memory_space<vmem>>, %arg6: memref<1x32xf32, #tpu.memory_space<vmem>>, %arg7: memref<32x32xbf16, #tpu.memory_space<vmem>>, %arg8: memref<32x32xbf16, #tpu.memory_space<vmem>>, %arg9: memref<1x32xf32, #tpu.memory_space<vmem>>, %arg10: memref<32x4xbf16, #tpu.memory_space<vmem>>, %arg11: memref<32x4xbf16, #tpu.memory_space<vmem>>, %arg12: memref<1x4xf32, #tpu.memory_space<vmem>>, %arg13: memref<32x64xbf16, #tpu.memory_space<vmem>>, %arg14: memref<32x64xbf16, #tpu.memory_space<vmem>>, %arg15: memref<1x64xf32, #tpu.memory_space<vmem>>, %arg16: memref<64x64xbf16, #tpu.memory_space<vmem>>, %arg17: memref<64x64xbf16, #tpu.memory_space<vmem>>, %arg18: memref<1x64xf32, #tpu.memory_space<vmem>>, %arg19: memref<64x128xbf16, #tpu.memory_space<vmem>>, %arg20: memref<1x128xf32, #tpu.memory_space<vmem>>, %arg21: memref<1x4x128xf32, #tpu.memory_space<vmem>>, %arg22: memref<1x1x128xf32, #tpu.memory_space<vmem>>) attributes {dimension_semantics = [#tpu.dimension_semantics<parallel>], iteration_bounds = array<i64: 2>, scalar_prefetch = 1 : i64, scratch_operands = 0 : i64, tpu.core_type = #tpu.core_type<tc>, window_params = [{transform_indices = @transform_0, window_bounds = array<i64: 4, 16, 4>}, {transform_indices = @transform_1, window_bounds = array<i64: 4, 16, 16>}, {pipeline_mode = #tpu.pipeline_mode<synchronous>, transform_indices = @transform_2, window_bounds = array<i64: 4, 32>}, {pipeline_mode = #tpu.pipeline_mode<synchronous>, transform_indices = @transform_3, window_bounds = array<i64: 4, 32>}, {pipeline_mode = #tpu.pipeline_mode<synchronous>, transform_indices = @transform_4, window_bounds = array<i64: 1, 32>}, {pipeline_mode = #tpu.pipeline_mode<synchronous>, transform_indices = @transform_5, window_bounds = array<i64: 32, 32>}, {pipeline_mode = #tpu.pipeline_mode<synchronous>, transform_indices = @transform_6, window_bounds = array<i64: 32, 32>}, {pipeline_mode = #tpu.pipeline_mode<synchronous>, transform_indices = @transform_7, window_bounds = array<i64: 1, 32>}, {pipeline_mode = #tpu.pipeline_mode<synchronous>, transform_indices = @transform_8, window_bounds = array<i64: 32, 4>}, {pipeline_mode = #tpu.pipeline_mode<synchronous>, transform_indices = @transform_9, window_bounds = array<i64: 32, 4>}, {pipeline_mode = #tpu.pipeline_mode<synchronous>, transform_indices = @transform_10, window_bounds = array<i64: 1, 4>}, {pipeline_mode = #tpu.pipeline_mode<synchronous>, transform_indices = @transform_11, window_bounds = array<i64: 32, 64>}, {pipeline_mode = #tpu.pipeline_mode<synchronous>, transform_indices = @transform_12, window_bounds = array<i64: 32, 64>}, {pipeline_mode = #tpu.pipeline_mode<synchronous>, transform_indices = @transform_13, window_bounds = array<i64: 1, 64>}, {pipeline_mode = #tpu.pipeline_mode<synchronous>, transform_indices = @transform_14, window_bounds = array<i64: 64, 64>}, {pipeline_mode = #tpu.pipeline_mode<synchronous>, transform_indices = @transform_15, window_bounds = array<i64: 64, 64>}, {pipeline_mode = #tpu.pipeline_mode<synchronous>, transform_indices = @transform_16, window_bounds = array<i64: 1, 64>}, {pipeline_mode = #tpu.pipeline_mode<synchronous>, transform_indices = @transform_17, window_bounds = array<i64: 64, 128>}, {pipeline_mode = #tpu.pipeline_mode<synchronous>, transform_indices = @transform_18, window_bounds = array<i64: 1, 128>}, {transform_indices = @transform_19, window_bounds = array<i64: 1, 4, 128>}, {transform_indices = @transform_20, window_bounds = array<i64: 1, 1, 128>}]} {
    %c4_i32 = arith.constant 4 : i32
    %0 = arith.muli %arg0, %c4_i32 : i32
    %1 = tpu.iota {dimensions = array<i32: 0>} : vector<4x16x1xi32>
    %2 = tpu.iota {dimensions = array<i32: 1>} : vector<4x16x1xi32>
    %c0_i32 = arith.constant 0 : i32
    %3 = vector.broadcast %c0_i32 : i32 to vector<4x16x1xi32>
    %c0_i32_0 = arith.constant 0 : i32
    %4 = vector.broadcast %c0_i32_0 : i32 to vector<4x16x1xi32>
    %5 = arith.cmpi eq, %1, %4 : vector<4x16x1xi32>
    %c0_i32_1 = arith.constant 0 : i32
    %6 = arith.addi %0, %c0_i32_1 : i32
    %7 = arith.index_cast %6 : i32 to index
    %8 = memref.load %arg1[%7] : memref<8xi32, #tpu.memory_space<smem>>
    %9 = vector.broadcast %8 : i32 to vector<4x16x1xi32>
    %10 = arith.select %5, %9, %3 : vector<4x16x1xi1>, vector<4x16x1xi32>
    %c1_i32 = arith.constant 1 : i32
    %11 = vector.broadcast %c1_i32 : i32 to vector<4x16x1xi32>
    %12 = arith.cmpi eq, %1, %11 : vector<4x16x1xi32>
    %c1_i32_2 = arith.constant 1 : i32
    %13 = arith.addi %0, %c1_i32_2 : i32
    %14 = arith.index_cast %13 : i32 to index
    %15 = memref.load %arg1[%14] : memref<8xi32, #tpu.memory_space<smem>>
    %16 = vector.broadcast %15 : i32 to vector<4x16x1xi32>
    %17 = arith.select %12, %16, %10 : vector<4x16x1xi1>, vector<4x16x1xi32>
    %c2_i32 = arith.constant 2 : i32
    %18 = vector.broadcast %c2_i32 : i32 to vector<4x16x1xi32>
    %19 = arith.cmpi eq, %1, %18 : vector<4x16x1xi32>
    %c2_i32_3 = arith.constant 2 : i32
    %20 = arith.addi %0, %c2_i32_3 : i32
    %21 = arith.index_cast %20 : i32 to index
    %22 = memref.load %arg1[%21] : memref<8xi32, #tpu.memory_space<smem>>
    %23 = vector.broadcast %22 : i32 to vector<4x16x1xi32>
    %24 = arith.select %19, %23, %17 : vector<4x16x1xi1>, vector<4x16x1xi32>
    %c3_i32 = arith.constant 3 : i32
    %25 = vector.broadcast %c3_i32 : i32 to vector<4x16x1xi32>
    %26 = arith.cmpi eq, %1, %25 : vector<4x16x1xi32>
    %c3_i32_4 = arith.constant 3 : i32
    %27 = arith.addi %0, %c3_i32_4 : i32
    %28 = arith.index_cast %27 : i32 to index
    %29 = memref.load %arg1[%28] : memref<8xi32, #tpu.memory_space<smem>>
    %30 = vector.broadcast %29 : i32 to vector<4x16x1xi32>
    %31 = arith.select %26, %30, %24 : vector<4x16x1xi1>, vector<4x16x1xi32>
    %32 = arith.cmpi slt, %2, %31 : vector<4x16x1xi32>
    %33 = arith.extui %32 : vector<4x16x1xi1> to vector<4x16x1xi32>
    %34 = arith.sitofp %33 : vector<4x16x1xi32> to vector<4x16x1xf32>
    %c0 = arith.constant 0 : index
    %c0_5 = arith.constant 0 : index
    %c0_6 = arith.constant 0 : index
    %35 = vector.load %arg3[%c0, %c0_5, %c0_6] : memref<4x16x16xbf16, #tpu.memory_space<vmem>>, vector<4x16x16xbf16>
    %36 = arith.extf %35 : vector<4x16x16xbf16> to vector<4x16x16xf32>
    %c0_7 = arith.constant 0 : index
    %c0_8 = arith.constant 0 : index
    %c0_9 = arith.constant 0 : index
    %37 = vector.load %arg2[%c0_7, %c0_8, %c0_9] : memref<4x16x4xbf16, #tpu.memory_space<vmem>>, vector<4x16x4xbf16>
    %cst = arith.constant dense<0.000000e+00> : vector<4x16xf32>
    %38 = vector.multi_reduction <add>, %36, %cst [2] : vector<4x16x16xf32> to vector<4x16xf32>
    %39 = vector.shape_cast %38 : vector<4x16xf32> to vector<4x16x1xf32>
    %cst_10 = arith.constant 1.000000e+00 : f32
    %40 = vector.broadcast %cst_10 : f32 to vector<4x16x1xf32>
    %41 = arith.maximumf %39, %40 : vector<4x16x1xf32>
    %42 = tpu.reciprocal %41 {approx = true} : vector<4x16x1xf32> -> vector<4x16x1xf32>
    "tpu.trace_start"() <{level = 10 : i32, message = "gij,gjc->gic"}> : () -> ()
    %cst_11 = arith.constant dense<0.000000e+00> : vector<4x16x4xf32>
    %43 = tpu.matmul %35, %37, %cst_11 {dimension_numbers = #tpu.dot_dimension_numbers<[2], [1], [1], [2], [0, 0, 0, 1, 1, 2], [0], [0]>} : vector<4x16x16xbf16>, vector<4x16x4xbf16>, vector<4x16x4xf32> -> vector<4x16x4xf32>
    "tpu.trace_stop"() : () -> ()
    %44 = vector.broadcast %42 : vector<4x16x1xf32> to vector<4x16x4xf32>
    %45 = arith.mulf %43, %44 : vector<4x16x4xf32>
    %46 = arith.truncf %45 : vector<4x16x4xf32> to vector<4x16x4xbf16>
    %47 = vector.shape_cast %46 : vector<4x16x4xbf16> to vector<64x4xbf16>
    %c0_12 = arith.constant 0 : index
    %c0_13 = arith.constant 0 : index
    %48 = vector.load %arg4[%c0_12, %c0_13] : memref<4x32xbf16, #tpu.memory_space<vmem>>, vector<4x32xbf16>
    %cst_14 = arith.constant dense<0.000000e+00> : vector<64x32xf32>
    %49 = tpu.matmul %47, %48, %cst_14 {dimension_numbers = #tpu.dot_dimension_numbers<[1], [0], [0], [1], [0, 0, 1, 1], [], []>} : vector<64x4xbf16>, vector<4x32xbf16>, vector<64x32xf32> -> vector<64x32xf32>
    %50 = vector.shape_cast %37 : vector<4x16x4xbf16> to vector<64x4xbf16>
    %c0_15 = arith.constant 0 : index
    %c0_16 = arith.constant 0 : index
    %51 = vector.load %arg5[%c0_15, %c0_16] : memref<4x32xbf16, #tpu.memory_space<vmem>>, vector<4x32xbf16>
    %cst_17 = arith.constant dense<0.000000e+00> : vector<64x32xf32>
    %52 = tpu.matmul %50, %51, %cst_17 {dimension_numbers = #tpu.dot_dimension_numbers<[1], [0], [0], [1], [0, 0, 1, 1], [], []>} : vector<64x4xbf16>, vector<4x32xbf16>, vector<64x32xf32> -> vector<64x32xf32>
    %53 = arith.addf %49, %52 : vector<64x32xf32>
    %c0_18 = arith.constant 0 : index
    %c0_19 = arith.constant 0 : index
    %54 = vector.load %arg6[%c0_18, %c0_19] : memref<1x32xf32, #tpu.memory_space<vmem>>, vector<1x32xf32>
    %55 = vector.broadcast %54 : vector<1x32xf32> to vector<64x32xf32>
    %56 = arith.addf %53, %55 : vector<64x32xf32>
    %57 = vector.shape_cast %56 : vector<64x32xf32> to vector<4x16x32xf32>
    %58 = vector.broadcast %34 : vector<4x16x1xf32> to vector<4x16x32xf32>
    %59 = arith.mulf %57, %58 : vector<4x16x32xf32>
    %cst_20 = arith.constant 0.000000e+00 : f32
    %60 = vector.broadcast %cst_20 : f32 to vector<4x16x32xf32>
    %61 = arith.maximumf %59, %60 : vector<4x16x32xf32>
    %62 = arith.truncf %61 : vector<4x16x32xf32> to vector<4x16x32xbf16>
    "tpu.trace_start"() <{level = 10 : i32, message = "gij,gjc->gic"}> : () -> ()
    %cst_21 = arith.constant dense<0.000000e+00> : vector<4x16x32xf32>
    %63 = tpu.matmul %35, %62, %cst_21 {dimension_numbers = #tpu.dot_dimension_numbers<[2], [1], [1], [2], [0, 0, 0, 1, 1, 2], [0], [0]>} : vector<4x16x16xbf16>, vector<4x16x32xbf16>, vector<4x16x32xf32> -> vector<4x16x32xf32>
    "tpu.trace_stop"() : () -> ()
    %64 = vector.broadcast %42 : vector<4x16x1xf32> to vector<4x16x32xf32>
    %65 = arith.mulf %63, %64 : vector<4x16x32xf32>
    %66 = arith.truncf %65 : vector<4x16x32xf32> to vector<4x16x32xbf16>
    %67 = vector.shape_cast %66 : vector<4x16x32xbf16> to vector<64x32xbf16>
    %c0_22 = arith.constant 0 : index
    %c0_23 = arith.constant 0 : index
    %68 = vector.load %arg7[%c0_22, %c0_23] : memref<32x32xbf16, #tpu.memory_space<vmem>>, vector<32x32xbf16>
    %cst_24 = arith.constant dense<0.000000e+00> : vector<64x32xf32>
    %69 = tpu.matmul %67, %68, %cst_24 {dimension_numbers = #tpu.dot_dimension_numbers<[1], [0], [0], [1], [0, 0, 1, 1], [], []>} : vector<64x32xbf16>, vector<32x32xbf16>, vector<64x32xf32> -> vector<64x32xf32>
    %70 = vector.shape_cast %62 : vector<4x16x32xbf16> to vector<64x32xbf16>
    %c0_25 = arith.constant 0 : index
    %c0_26 = arith.constant 0 : index
    %71 = vector.load %arg8[%c0_25, %c0_26] : memref<32x32xbf16, #tpu.memory_space<vmem>>, vector<32x32xbf16>
    %cst_27 = arith.constant dense<0.000000e+00> : vector<64x32xf32>
    %72 = tpu.matmul %70, %71, %cst_27 {dimension_numbers = #tpu.dot_dimension_numbers<[1], [0], [0], [1], [0, 0, 1, 1], [], []>} : vector<64x32xbf16>, vector<32x32xbf16>, vector<64x32xf32> -> vector<64x32xf32>
    %73 = arith.addf %69, %72 : vector<64x32xf32>
    %c0_28 = arith.constant 0 : index
    %c0_29 = arith.constant 0 : index
    %74 = vector.load %arg9[%c0_28, %c0_29] : memref<1x32xf32, #tpu.memory_space<vmem>>, vector<1x32xf32>
    %75 = vector.broadcast %74 : vector<1x32xf32> to vector<64x32xf32>
    %76 = arith.addf %73, %75 : vector<64x32xf32>
    %77 = vector.shape_cast %76 : vector<64x32xf32> to vector<4x16x32xf32>
    %78 = vector.broadcast %34 : vector<4x16x1xf32> to vector<4x16x32xf32>
    %79 = arith.mulf %77, %78 : vector<4x16x32xf32>
    %cst_30 = arith.constant 0.000000e+00 : f32
    %80 = vector.broadcast %cst_30 : f32 to vector<4x16x32xf32>
    %81 = arith.maximumf %79, %80 : vector<4x16x32xf32>
    %82 = arith.truncf %81 : vector<4x16x32xf32> to vector<4x16x32xbf16>
    "tpu.trace_start"() <{level = 10 : i32, message = "gij,gjc->gic"}> : () -> ()
    %cst_31 = arith.constant dense<0.000000e+00> : vector<4x16x32xf32>
    %83 = tpu.matmul %35, %82, %cst_31 {dimension_numbers = #tpu.dot_dimension_numbers<[2], [1], [1], [2], [0, 0, 0, 1, 1, 2], [0], [0]>} : vector<4x16x16xbf16>, vector<4x16x32xbf16>, vector<4x16x32xf32> -> vector<4x16x32xf32>
    "tpu.trace_stop"() : () -> ()
    %84 = vector.broadcast %42 : vector<4x16x1xf32> to vector<4x16x32xf32>
    %85 = arith.mulf %83, %84 : vector<4x16x32xf32>
    %86 = arith.truncf %85 : vector<4x16x32xf32> to vector<4x16x32xbf16>
    %87 = vector.shape_cast %86 : vector<4x16x32xbf16> to vector<64x32xbf16>
    %c0_32 = arith.constant 0 : index
    %c0_33 = arith.constant 0 : index
    %88 = vector.load %arg10[%c0_32, %c0_33] : memref<32x4xbf16, #tpu.memory_space<vmem>>, vector<32x4xbf16>
    %cst_34 = arith.constant dense<0.000000e+00> : vector<64x4xf32>
    %89 = tpu.matmul %87, %88, %cst_34 {dimension_numbers = #tpu.dot_dimension_numbers<[1], [0], [0], [1], [0, 0, 1, 1], [], []>} : vector<64x32xbf16>, vector<32x4xbf16>, vector<64x4xf32> -> vector<64x4xf32>
    %90 = vector.shape_cast %82 : vector<4x16x32xbf16> to vector<64x32xbf16>
    %c0_35 = arith.constant 0 : index
    %c0_36 = arith.constant 0 : index
    %91 = vector.load %arg11[%c0_35, %c0_36] : memref<32x4xbf16, #tpu.memory_space<vmem>>, vector<32x4xbf16>
    %cst_37 = arith.constant dense<0.000000e+00> : vector<64x4xf32>
    %92 = tpu.matmul %90, %91, %cst_37 {dimension_numbers = #tpu.dot_dimension_numbers<[1], [0], [0], [1], [0, 0, 1, 1], [], []>} : vector<64x32xbf16>, vector<32x4xbf16>, vector<64x4xf32> -> vector<64x4xf32>
    %93 = arith.addf %89, %92 : vector<64x4xf32>
    %c0_38 = arith.constant 0 : index
    %c0_39 = arith.constant 0 : index
    %94 = vector.load %arg12[%c0_38, %c0_39] : memref<1x4xf32, #tpu.memory_space<vmem>>, vector<1x4xf32>
    %95 = vector.broadcast %94 : vector<1x4xf32> to vector<64x4xf32>
    %96 = arith.addf %93, %95 : vector<64x4xf32>
    %97 = vector.shape_cast %96 : vector<64x4xf32> to vector<4x16x4xf32>
    %98 = vector.broadcast %34 : vector<4x16x1xf32> to vector<4x16x4xf32>
    %99 = arith.mulf %97, %98 : vector<4x16x4xf32>
    %cst_40 = arith.constant dense<0xFF800000> : vector<4x16xf32>
    %100 = vector.multi_reduction <maximumf>, %99, %cst_40 [2] : vector<4x16x4xf32> to vector<4x16xf32>
    %cst_41 = arith.constant 0xFF800000 : f32
    %101 = vector.broadcast %cst_41 : f32 to vector<4x16xf32>
    %102 = arith.maximumf %101, %100 : vector<4x16xf32>
    %103 = vector.shape_cast %102 : vector<4x16xf32> to vector<4x16x1xf32>
    %104 = vector.broadcast %103 : vector<4x16x1xf32> to vector<4x16x4xf32>
    %105 = arith.subf %99, %104 : vector<4x16x4xf32>
    %106 = math.exp %105 : vector<4x16x4xf32>
    %cst_42 = arith.constant dense<0.000000e+00> : vector<4x16xf32>
    %107 = vector.multi_reduction <add>, %106, %cst_42 [2] : vector<4x16x4xf32> to vector<4x16xf32>
    %108 = vector.shape_cast %107 : vector<4x16xf32> to vector<4x16x1xf32>
    %109 = vector.broadcast %108 : vector<4x16x1xf32> to vector<4x16x4xf32>
    %110 = arith.divf %106, %109 : vector<4x16x4xf32>
    %111 = vector.broadcast %34 : vector<4x16x1xf32> to vector<4x16x4xf32>
    %112 = arith.mulf %110, %111 : vector<4x16x4xf32>
    %113 = vector.broadcast %34 : vector<4x16x1xf32> to vector<4x16x32xf32>
    %114 = arith.mulf %81, %113 : vector<4x16x32xf32>
    %115 = arith.truncf %112 : vector<4x16x4xf32> to vector<4x16x4xbf16>
    %116 = arith.truncf %114 : vector<4x16x32xf32> to vector<4x16x32xbf16>
    "tpu.trace_start"() <{level = 10 : i32, message = "gnk,gnc->gkc"}> : () -> ()
    %cst_43 = arith.constant dense<0.000000e+00> : vector<4x4x32xf32>
    %117 = tpu.matmul %115, %116, %cst_43 {dimension_numbers = #tpu.dot_dimension_numbers<[1], [1], [2], [2], [0, 0, 0, 2, 1, 2], [0], [0]>} : vector<4x16x4xbf16>, vector<4x16x32xbf16>, vector<4x4x32xf32> -> vector<4x4x32xf32>
    "tpu.trace_stop"() : () -> ()
    "tpu.trace_start"() <{level = 10 : i32, message = "gij,gjk->gik"}> : () -> ()
    %cst_44 = arith.constant dense<0.000000e+00> : vector<4x16x4xf32>
    %118 = tpu.matmul %35, %115, %cst_44 {dimension_numbers = #tpu.dot_dimension_numbers<[2], [1], [1], [2], [0, 0, 0, 1, 1, 2], [0], [0]>} : vector<4x16x16xbf16>, vector<4x16x4xbf16>, vector<4x16x4xf32> -> vector<4x16x4xf32>
    "tpu.trace_stop"() : () -> ()
    %119 = arith.truncf %118 : vector<4x16x4xf32> to vector<4x16x4xbf16>
    "tpu.trace_start"() <{level = 10 : i32, message = "gnk,gnl->gkl"}> : () -> ()
    %cst_45 = arith.constant dense<0.000000e+00> : vector<4x4x4xf32>
    %120 = tpu.matmul %115, %119, %cst_45 {dimension_numbers = #tpu.dot_dimension_numbers<[1], [1], [2], [2], [0, 0, 0, 2, 1, 2], [0], [0]>} : vector<4x16x4xbf16>, vector<4x16x4xbf16>, vector<4x4x4xf32> -> vector<4x4x4xf32>
    %cst_46 = arith.constant dense<0.000000e+00> : vector<4x4x4xf32>
    %121 = tpu.matmul %115, %115, %cst_46 {dimension_numbers = #tpu.dot_dimension_numbers<[1], [1], [2], [2], [0, 0, 0, 2, 1, 2], [0], [0]>} : vector<4x16x4xbf16>, vector<4x16x4xbf16>, vector<4x4x4xf32> -> vector<4x4x4xf32>
    "tpu.trace_stop"() : () -> ()
    %122 = arith.mulf %36, %36 : vector<4x16x16xf32>
    %cst_47 = arith.constant dense<0.000000e+00> : vector<4x16xf32>
    %123 = vector.multi_reduction <add>, %122, %cst_47 [2] : vector<4x16x16xf32> to vector<4x16xf32>
    %124 = vector.shape_cast %123 : vector<4x16xf32> to vector<4x16x1xf32>
    %cst_48 = arith.constant dense<0.000000e+00> : vector<4x1xf32>
    %125 = vector.multi_reduction <add>, %124, %cst_48 [1] : vector<4x16x1xf32> to vector<4x1xf32>
    %126 = vector.shape_cast %125 : vector<4x1xf32> to vector<4x1x1xf32>
    %127 = arith.mulf %112, %118 : vector<4x16x4xf32>
    %cst_49 = arith.constant dense<0.000000e+00> : vector<4x16xf32>
    %128 = vector.multi_reduction <add>, %127, %cst_49 [2] : vector<4x16x4xf32> to vector<4x16xf32>
    %129 = vector.shape_cast %128 : vector<4x16xf32> to vector<4x16x1xf32>
    %cst_50 = arith.constant dense<0.000000e+00> : vector<4x1xf32>
    %130 = vector.multi_reduction <add>, %129, %cst_50 [1] : vector<4x16x1xf32> to vector<4x1xf32>
    %131 = vector.shape_cast %130 : vector<4x1xf32> to vector<4x1x1xf32>
    %132 = arith.mulf %121, %121 : vector<4x4x4xf32>
    %cst_51 = arith.constant dense<0.000000e+00> : vector<4x4xf32>
    %133 = vector.multi_reduction <add>, %132, %cst_51 [2] : vector<4x4x4xf32> to vector<4x4xf32>
    %134 = vector.shape_cast %133 : vector<4x4xf32> to vector<4x4x1xf32>
    %cst_52 = arith.constant dense<0.000000e+00> : vector<4x1xf32>
    %135 = vector.multi_reduction <add>, %134, %cst_52 [1] : vector<4x4x1xf32> to vector<4x1xf32>
    %136 = vector.shape_cast %135 : vector<4x1xf32> to vector<4x1x1xf32>
    %cst_53 = arith.constant 2.000000e+00 : f32
    %137 = vector.broadcast %cst_53 : f32 to vector<4x1x1xf32>
    %138 = arith.mulf %137, %131 : vector<4x1x1xf32>
    %139 = arith.subf %126, %138 : vector<4x1x1xf32>
    %140 = arith.addf %139, %136 : vector<4x1x1xf32>
    %cst_54 = arith.constant 0.000000e+00 : f32
    %141 = vector.broadcast %cst_54 : f32 to vector<4x1x1xf32>
    %142 = arith.maximumf %140, %141 : vector<4x1x1xf32>
    %cst_55 = arith.constant 0.000000e+00 : f32
    %143 = vector.broadcast %cst_55 : f32 to vector<4x16x4xf32>
    %144 = arith.subf %143, %112 : vector<4x16x4xf32>
    %cst_56 = arith.constant 1.000000e-15 : f32
    %145 = vector.broadcast %cst_56 : f32 to vector<4x16x4xf32>
    %146 = arith.addf %112, %145 : vector<4x16x4xf32>
    %147 = math.log %146 : vector<4x16x4xf32>
    %148 = arith.mulf %144, %147 : vector<4x16x4xf32>
    %cst_57 = arith.constant dense<0.000000e+00> : vector<4x16xf32>
    %149 = vector.multi_reduction <add>, %148, %cst_57 [2] : vector<4x16x4xf32> to vector<4x16xf32>
    %150 = vector.shape_cast %149 : vector<4x16xf32> to vector<4x16x1xf32>
    %cst_58 = arith.constant dense<0.000000e+00> : vector<4x1xf32>
    %151 = vector.multi_reduction <add>, %150, %cst_58 [1] : vector<4x16x1xf32> to vector<4x1xf32>
    %152 = vector.shape_cast %151 : vector<4x1xf32> to vector<4x1x1xf32>
    %cst_59 = arith.constant dense<0.000000e+00> : vector<4x4xf32>
    %153 = vector.multi_reduction <add>, %120, %cst_59 [2] : vector<4x4x4xf32> to vector<4x4xf32>
    %154 = vector.shape_cast %153 : vector<4x4xf32> to vector<4x4x1xf32>
    %cst_60 = arith.constant 1.000000e+00 : f32
    %155 = vector.broadcast %cst_60 : f32 to vector<4x4x1xf32>
    %156 = arith.maximumf %154, %155 : vector<4x4x1xf32>
    %157 = tpu.reciprocal %156 {approx = true} : vector<4x4x1xf32> -> vector<4x4x1xf32>
    %158 = arith.truncf %120 : vector<4x4x4xf32> to vector<4x4x4xbf16>
    %159 = arith.truncf %117 : vector<4x4x32xf32> to vector<4x4x32xbf16>
    "tpu.trace_start"() <{level = 10 : i32, message = "gij,gjc->gic"}> : () -> ()
    %cst_61 = arith.constant dense<0.000000e+00> : vector<4x4x32xf32>
    %160 = tpu.matmul %158, %159, %cst_61 {dimension_numbers = #tpu.dot_dimension_numbers<[2], [1], [1], [2], [0, 0, 0, 1, 1, 2], [0], [0]>} : vector<4x4x4xbf16>, vector<4x4x32xbf16>, vector<4x4x32xf32> -> vector<4x4x32xf32>
    "tpu.trace_stop"() : () -> ()
    %161 = vector.broadcast %157 : vector<4x4x1xf32> to vector<4x4x32xf32>
    %162 = arith.mulf %160, %161 : vector<4x4x32xf32>
    %163 = arith.truncf %162 : vector<4x4x32xf32> to vector<4x4x32xbf16>
    %164 = vector.shape_cast %163 : vector<4x4x32xbf16> to vector<16x32xbf16>
    %c0_62 = arith.constant 0 : index
    %c0_63 = arith.constant 0 : index
    %165 = vector.load %arg13[%c0_62, %c0_63] : memref<32x64xbf16, #tpu.memory_space<vmem>>, vector<32x64xbf16>
    %cst_64 = arith.constant dense<0.000000e+00> : vector<16x64xf32>
    %166 = tpu.matmul %164, %165, %cst_64 {dimension_numbers = #tpu.dot_dimension_numbers<[1], [0], [0], [1], [0, 0, 1, 1], [], []>} : vector<16x32xbf16>, vector<32x64xbf16>, vector<16x64xf32> -> vector<16x64xf32>
    %167 = vector.shape_cast %159 : vector<4x4x32xbf16> to vector<16x32xbf16>
    %c0_65 = arith.constant 0 : index
    %c0_66 = arith.constant 0 : index
    %168 = vector.load %arg14[%c0_65, %c0_66] : memref<32x64xbf16, #tpu.memory_space<vmem>>, vector<32x64xbf16>
    %cst_67 = arith.constant dense<0.000000e+00> : vector<16x64xf32>
    %169 = tpu.matmul %167, %168, %cst_67 {dimension_numbers = #tpu.dot_dimension_numbers<[1], [0], [0], [1], [0, 0, 1, 1], [], []>} : vector<16x32xbf16>, vector<32x64xbf16>, vector<16x64xf32> -> vector<16x64xf32>
    %170 = arith.addf %166, %169 : vector<16x64xf32>
    %c0_68 = arith.constant 0 : index
    %c0_69 = arith.constant 0 : index
    %171 = vector.load %arg15[%c0_68, %c0_69] : memref<1x64xf32, #tpu.memory_space<vmem>>, vector<1x64xf32>
    %172 = vector.broadcast %171 : vector<1x64xf32> to vector<16x64xf32>
    %173 = arith.addf %170, %172 : vector<16x64xf32>
    %174 = vector.shape_cast %173 : vector<16x64xf32> to vector<4x4x64xf32>
    %cst_70 = arith.constant 0.000000e+00 : f32
    %175 = vector.broadcast %cst_70 : f32 to vector<4x4x64xf32>
    %176 = arith.maximumf %174, %175 : vector<4x4x64xf32>
    %177 = arith.truncf %176 : vector<4x4x64xf32> to vector<4x4x64xbf16>
    "tpu.trace_start"() <{level = 10 : i32, message = "gij,gjc->gic"}> : () -> ()
    %cst_71 = arith.constant dense<0.000000e+00> : vector<4x4x64xf32>
    %178 = tpu.matmul %158, %177, %cst_71 {dimension_numbers = #tpu.dot_dimension_numbers<[2], [1], [1], [2], [0, 0, 0, 1, 1, 2], [0], [0]>} : vector<4x4x4xbf16>, vector<4x4x64xbf16>, vector<4x4x64xf32> -> vector<4x4x64xf32>
    "tpu.trace_stop"() : () -> ()
    %179 = vector.broadcast %157 : vector<4x4x1xf32> to vector<4x4x64xf32>
    %180 = arith.mulf %178, %179 : vector<4x4x64xf32>
    %181 = arith.truncf %180 : vector<4x4x64xf32> to vector<4x4x64xbf16>
    %182 = vector.shape_cast %181 : vector<4x4x64xbf16> to vector<16x64xbf16>
    %c0_72 = arith.constant 0 : index
    %c0_73 = arith.constant 0 : index
    %183 = vector.load %arg16[%c0_72, %c0_73] : memref<64x64xbf16, #tpu.memory_space<vmem>>, vector<64x64xbf16>
    %cst_74 = arith.constant dense<0.000000e+00> : vector<16x64xf32>
    %184 = tpu.matmul %182, %183, %cst_74 {dimension_numbers = #tpu.dot_dimension_numbers<[1], [0], [0], [1], [0, 0, 1, 1], [], []>} : vector<16x64xbf16>, vector<64x64xbf16>, vector<16x64xf32> -> vector<16x64xf32>
    %185 = vector.shape_cast %177 : vector<4x4x64xbf16> to vector<16x64xbf16>
    %c0_75 = arith.constant 0 : index
    %c0_76 = arith.constant 0 : index
    %186 = vector.load %arg17[%c0_75, %c0_76] : memref<64x64xbf16, #tpu.memory_space<vmem>>, vector<64x64xbf16>
    %cst_77 = arith.constant dense<0.000000e+00> : vector<16x64xf32>
    %187 = tpu.matmul %185, %186, %cst_77 {dimension_numbers = #tpu.dot_dimension_numbers<[1], [0], [0], [1], [0, 0, 1, 1], [], []>} : vector<16x64xbf16>, vector<64x64xbf16>, vector<16x64xf32> -> vector<16x64xf32>
    %188 = arith.addf %184, %187 : vector<16x64xf32>
    %c0_78 = arith.constant 0 : index
    %c0_79 = arith.constant 0 : index
    %189 = vector.load %arg18[%c0_78, %c0_79] : memref<1x64xf32, #tpu.memory_space<vmem>>, vector<1x64xf32>
    %190 = vector.broadcast %189 : vector<1x64xf32> to vector<16x64xf32>
    %191 = arith.addf %188, %190 : vector<16x64xf32>
    %192 = vector.shape_cast %191 : vector<16x64xf32> to vector<4x4x64xf32>
    %cst_80 = arith.constant 0.000000e+00 : f32
    %193 = vector.broadcast %cst_80 : f32 to vector<4x4x64xf32>
    %194 = arith.maximumf %192, %193 : vector<4x4x64xf32>
    %cst_81 = arith.constant dense<0.000000e+00> : vector<4x64xf32>
    %195 = vector.multi_reduction <add>, %194, %cst_81 [1] : vector<4x4x64xf32> to vector<4x64xf32>
    %cst_82 = arith.constant 4.000000e+00 : f32
    %196 = vector.broadcast %cst_82 : f32 to vector<4x64xf32>
    %197 = arith.divf %195, %196 : vector<4x64xf32>
    %198 = arith.truncf %197 : vector<4x64xf32> to vector<4x64xbf16>
    %c0_83 = arith.constant 0 : index
    %c0_84 = arith.constant 0 : index
    %199 = vector.load %arg19[%c0_83, %c0_84] : memref<64x128xbf16, #tpu.memory_space<vmem>>, vector<64x128xbf16>
    %cst_85 = arith.constant dense<0.000000e+00> : vector<4x128xf32>
    %200 = tpu.matmul %198, %199, %cst_85 {dimension_numbers = #tpu.dot_dimension_numbers<[1], [0], [0], [1], [0, 0, 1, 1], [], []>} : vector<4x64xbf16>, vector<64x128xbf16>, vector<4x128xf32> -> vector<4x128xf32>
    %c0_86 = arith.constant 0 : index
    %c0_87 = arith.constant 0 : index
    %201 = vector.load %arg20[%c0_86, %c0_87] : memref<1x128xf32, #tpu.memory_space<vmem>>, vector<1x128xf32>
    %202 = vector.broadcast %201 : vector<1x128xf32> to vector<4x128xf32>
    %203 = arith.addf %200, %202 : vector<4x128xf32>
    %c0_88 = arith.constant 0 : index
    %c0_89 = arith.constant 0 : index
    %c0_90 = arith.constant 0 : index
    %204 = vector.load %arg21[%c0_88, %c0_89, %c0_90] : memref<1x4x128xf32, #tpu.memory_space<vmem>>, vector<1x4x128xf32>
    %205 = vector.shape_cast %204 : vector<1x4x128xf32> to vector<4x128xf32>
    %206 = vector.shape_cast %203 : vector<4x128xf32> to vector<1x4x128xf32>
    tpu.vector_store %arg21[%c0_88, %c0_89, %c0_90], %206 {strides = array<i32>} : memref<1x4x128xf32, #tpu.memory_space<vmem>>, vector<1x4x128xf32>,
    %207 = tpu.iota {dimensions = array<i32: 1>} : vector<1x128xi32>
    %c0_i32_91 = arith.constant 0 : i32
    %208 = vector.broadcast %c0_i32_91 : i32 to vector<1x128xi32>
    %209 = arith.cmpi eq, %207, %208 : vector<1x128xi32>
    %210 = vector.shape_cast %142 : vector<4x1x1xf32> to vector<1x4x1x1xf32>
    %cst_92 = arith.constant dense<0.000000e+00> : vector<1xf32>
    %211 = vector.multi_reduction <add>, %210, %cst_92 [1, 2, 3] : vector<1x4x1x1xf32> to vector<1xf32>
    %212 = vector.shape_cast %211 : vector<1xf32> to vector<1x1x1x1xf32>
    %213 = vector.extract %212[0, 0, 0, 0] : f32 from vector<1x1x1x1xf32>
    %cst_93 = arith.constant 0.000000e+00 : f32
    %214 = vector.broadcast %213 : f32 to vector<1x128xf32>
    %215 = vector.broadcast %cst_93 : f32 to vector<1x128xf32>
    %216 = arith.select %209, %214, %215 : vector<1x128xi1>, vector<1x128xf32>
    %c1_i32_94 = arith.constant 1 : i32
    %217 = vector.broadcast %c1_i32_94 : i32 to vector<1x128xi32>
    %218 = arith.cmpi eq, %207, %217 : vector<1x128xi32>
    %219 = vector.shape_cast %152 : vector<4x1x1xf32> to vector<1x4x1x1xf32>
    %cst_95 = arith.constant dense<0.000000e+00> : vector<1xf32>
    %220 = vector.multi_reduction <add>, %219, %cst_95 [1, 2, 3] : vector<1x4x1x1xf32> to vector<1xf32>
    %221 = vector.shape_cast %220 : vector<1xf32> to vector<1x1x1x1xf32>
    %222 = vector.extract %221[0, 0, 0, 0] : f32 from vector<1x1x1x1xf32>
    %cst_96 = arith.constant 0.000000e+00 : f32
    %223 = vector.broadcast %222 : f32 to vector<1x128xf32>
    %224 = vector.broadcast %cst_96 : f32 to vector<1x128xf32>
    %225 = arith.select %218, %223, %224 : vector<1x128xi1>, vector<1x128xf32>
    %226 = arith.addf %216, %225 : vector<1x128xf32>
    %c0_97 = arith.constant 0 : index
    %c0_98 = arith.constant 0 : index
    %c0_99 = arith.constant 0 : index
    %227 = vector.load %arg22[%c0_97, %c0_98, %c0_99] : memref<1x1x128xf32, #tpu.memory_space<vmem>>, vector<1x1x128xf32>
    %228 = vector.shape_cast %227 : vector<1x1x128xf32> to vector<1x128xf32>
    %229 = vector.shape_cast %226 : vector<1x128xf32> to vector<1x1x128xf32>
    tpu.vector_store %arg22[%c0_97, %c0_98, %c0_99], %229 {strides = array<i32>} : memref<1x1x128xf32, #tpu.memory_space<vmem>>, vector<1x1x128xf32>,
    return
  }
  func.func @transform_0(%arg0: i32, %arg1: memref<8xi32, #tpu.memory_space<smem>>) -> (i32, i32, i32) {
    %c0_i32 = arith.constant 0 : i32
    %c0_i32_0 = arith.constant 0 : i32
    %c0_i32_1 = arith.constant 0 : i32
    return %arg0, %c0_i32, %c0_i32_0 : i32, i32, i32
  }
  func.func @transform_1(%arg0: i32, %arg1: memref<8xi32, #tpu.memory_space<smem>>) -> (i32, i32, i32) {
    %c0_i32 = arith.constant 0 : i32
    %c0_i32_0 = arith.constant 0 : i32
    %c0_i32_1 = arith.constant 0 : i32
    return %arg0, %c0_i32, %c0_i32_0 : i32, i32, i32
  }
  func.func @transform_2(%arg0: i32, %arg1: memref<8xi32, #tpu.memory_space<smem>>) -> (i32, i32) {
    %c0_i32 = arith.constant 0 : i32
    %c0_i32_0 = arith.constant 0 : i32
    %c0_i32_1 = arith.constant 0 : i32
    return %c0_i32, %c0_i32_0 : i32, i32
  }
  func.func @transform_3(%arg0: i32, %arg1: memref<8xi32, #tpu.memory_space<smem>>) -> (i32, i32) {
    %c0_i32 = arith.constant 0 : i32
    %c0_i32_0 = arith.constant 0 : i32
    %c0_i32_1 = arith.constant 0 : i32
    return %c0_i32, %c0_i32_0 : i32, i32
  }
  func.func @transform_4(%arg0: i32, %arg1: memref<8xi32, #tpu.memory_space<smem>>) -> (i32, i32) {
    %c0_i32 = arith.constant 0 : i32
    %c0_i32_0 = arith.constant 0 : i32
    %c0_i32_1 = arith.constant 0 : i32
    return %c0_i32, %c0_i32_0 : i32, i32
  }
  func.func @transform_5(%arg0: i32, %arg1: memref<8xi32, #tpu.memory_space<smem>>) -> (i32, i32) {
    %c0_i32 = arith.constant 0 : i32
    %c0_i32_0 = arith.constant 0 : i32
    %c0_i32_1 = arith.constant 0 : i32
    return %c0_i32, %c0_i32_0 : i32, i32
  }
  func.func @transform_6(%arg0: i32, %arg1: memref<8xi32, #tpu.memory_space<smem>>) -> (i32, i32) {
    %c0_i32 = arith.constant 0 : i32
    %c0_i32_0 = arith.constant 0 : i32
    %c0_i32_1 = arith.constant 0 : i32
    return %c0_i32, %c0_i32_0 : i32, i32
  }
  func.func @transform_7(%arg0: i32, %arg1: memref<8xi32, #tpu.memory_space<smem>>) -> (i32, i32) {
    %c0_i32 = arith.constant 0 : i32
    %c0_i32_0 = arith.constant 0 : i32
    %c0_i32_1 = arith.constant 0 : i32
    return %c0_i32, %c0_i32_0 : i32, i32
  }
  func.func @transform_8(%arg0: i32, %arg1: memref<8xi32, #tpu.memory_space<smem>>) -> (i32, i32) {
    %c0_i32 = arith.constant 0 : i32
    %c0_i32_0 = arith.constant 0 : i32
    %c0_i32_1 = arith.constant 0 : i32
    return %c0_i32, %c0_i32_0 : i32, i32
  }
  func.func @transform_9(%arg0: i32, %arg1: memref<8xi32, #tpu.memory_space<smem>>) -> (i32, i32) {
    %c0_i32 = arith.constant 0 : i32
    %c0_i32_0 = arith.constant 0 : i32
    %c0_i32_1 = arith.constant 0 : i32
    return %c0_i32, %c0_i32_0 : i32, i32
  }
  func.func @transform_10(%arg0: i32, %arg1: memref<8xi32, #tpu.memory_space<smem>>) -> (i32, i32) {
    %c0_i32 = arith.constant 0 : i32
    %c0_i32_0 = arith.constant 0 : i32
    %c0_i32_1 = arith.constant 0 : i32
    return %c0_i32, %c0_i32_0 : i32, i32
  }
  func.func @transform_11(%arg0: i32, %arg1: memref<8xi32, #tpu.memory_space<smem>>) -> (i32, i32) {
    %c0_i32 = arith.constant 0 : i32
    %c0_i32_0 = arith.constant 0 : i32
    %c0_i32_1 = arith.constant 0 : i32
    return %c0_i32, %c0_i32_0 : i32, i32
  }
  func.func @transform_12(%arg0: i32, %arg1: memref<8xi32, #tpu.memory_space<smem>>) -> (i32, i32) {
    %c0_i32 = arith.constant 0 : i32
    %c0_i32_0 = arith.constant 0 : i32
    %c0_i32_1 = arith.constant 0 : i32
    return %c0_i32, %c0_i32_0 : i32, i32
  }
  func.func @transform_13(%arg0: i32, %arg1: memref<8xi32, #tpu.memory_space<smem>>) -> (i32, i32) {
    %c0_i32 = arith.constant 0 : i32
    %c0_i32_0 = arith.constant 0 : i32
    %c0_i32_1 = arith.constant 0 : i32
    return %c0_i32, %c0_i32_0 : i32, i32
  }
  func.func @transform_14(%arg0: i32, %arg1: memref<8xi32, #tpu.memory_space<smem>>) -> (i32, i32) {
    %c0_i32 = arith.constant 0 : i32
    %c0_i32_0 = arith.constant 0 : i32
    %c0_i32_1 = arith.constant 0 : i32
    return %c0_i32, %c0_i32_0 : i32, i32
  }
  func.func @transform_15(%arg0: i32, %arg1: memref<8xi32, #tpu.memory_space<smem>>) -> (i32, i32) {
    %c0_i32 = arith.constant 0 : i32
    %c0_i32_0 = arith.constant 0 : i32
    %c0_i32_1 = arith.constant 0 : i32
    return %c0_i32, %c0_i32_0 : i32, i32
  }
  func.func @transform_16(%arg0: i32, %arg1: memref<8xi32, #tpu.memory_space<smem>>) -> (i32, i32) {
    %c0_i32 = arith.constant 0 : i32
    %c0_i32_0 = arith.constant 0 : i32
    %c0_i32_1 = arith.constant 0 : i32
    return %c0_i32, %c0_i32_0 : i32, i32
  }
  func.func @transform_17(%arg0: i32, %arg1: memref<8xi32, #tpu.memory_space<smem>>) -> (i32, i32) {
    %c0_i32 = arith.constant 0 : i32
    %c0_i32_0 = arith.constant 0 : i32
    %c0_i32_1 = arith.constant 0 : i32
    return %c0_i32, %c0_i32_0 : i32, i32
  }
  func.func @transform_18(%arg0: i32, %arg1: memref<8xi32, #tpu.memory_space<smem>>) -> (i32, i32) {
    %c0_i32 = arith.constant 0 : i32
    %c0_i32_0 = arith.constant 0 : i32
    %c0_i32_1 = arith.constant 0 : i32
    return %c0_i32, %c0_i32_0 : i32, i32
  }
  func.func @transform_19(%arg0: i32, %arg1: memref<8xi32, #tpu.memory_space<smem>>) -> (i32, i32, i32) {
    %c0_i32 = arith.constant 0 : i32
    %c0_i32_0 = arith.constant 0 : i32
    %c0_i32_1 = arith.constant 0 : i32
    return %arg0, %c0_i32, %c0_i32_0 : i32, i32, i32
  }
  func.func @transform_20(%arg0: i32, %arg1: memref<8xi32, #tpu.memory_space<smem>>) -> (i32, i32, i32) {
    %c0_i32 = arith.constant 0 : i32
    %c0_i32_0 = arith.constant 0 : i32
    %c0_i32_1 = arith.constant 0 : i32
    return %arg0, %c0_i32, %c0_i32_0 : i32, i32, i32
  }
}

</mosaic_0001>

<bundles_post_ra>
// kernel: net_forward.1
= control target key start
LH: loop header
LB: loop body
LE: loop exit
PB: predicated region body
PF: predicated region fallthrough
CT: control target
= control target key end

     0   :  { %s5920_s0 = inlined_call_operand.vmem [shape: s32[8], index: 0, kind: input, shape index: {}]   ;;  %s5921_s1 = inlined_call_operand.vmem [shape: bf16[8,16,4], index: 1, kind: input, shape index: {}]   ;;  %s5922_s2 = inlined_call_operand.vmem [shape: bf16[8,16,16], index: 2, kind: input, shape index: {}]   ;;  %s5923_s3 = inlined_call_operand.vmem [shape: bf16[4,32], index: 3, kind: input, shape index: {}]   ;;  %s5924_s4 = inlined_call_operand.vmem [shape: bf16[4,32], index: 4, kind: input, shape index: {}]   ;;  %s5925_s5 = inlined_call_operand.vmem [shape: f32[1,32], index: 5, kind: input, shape index: {}]   ;;  %s5926_s6 = inlined_call_operand.vmem [shape: bf16[32,32], index: 6, kind: input, shape index: {}]   ;;  %s5927_s7 = inlined_call_operand.vmem [shape: bf16[32,32], index: 7, kind: input, shape index: {}]   ;;  %s5928_s8 = inlined_call_operand.vmem [shape: f32[1,32], index: 8, kind: input, shape index: {}]   ;;  %s5929_s9 = inlined_call_operand.vmem [shape: bf16[32,4], index: 9, kind: input, shape index: {}]   ;;  %s5930_s10 = inlined_call_operand.vmem [shape: bf16[32,4], index: 10, kind: input, shape index: {}]   ;;  %s5931_s11 = inlined_call_operand.vmem [shape: f32[1,4], index: 11, kind: input, shape index: {}]   ;;  %s5932_s12 = inlined_call_operand.vmem [shape: bf16[32,64], index: 12, kind: input, shape index: {}]   ;;  %s5933_s13 = inlined_call_operand.vmem [shape: bf16[32,64], index: 13, kind: input, shape index: {}]   ;;  %s5934_s14 = inlined_call_operand.vmem [shape: f32[1,64], index: 14, kind: input, shape index: {}]   ;;  %s5935_s15 = inlined_call_operand.vmem [shape: bf16[64,64], index: 15, kind: input, shape index: {}]   ;;  %s5936_s16 = inlined_call_operand.vmem [shape: bf16[64,64], index: 16, kind: input, shape index: {}]   ;;  %s5937_s17 = inlined_call_operand.vmem [shape: f32[1,64], index: 17, kind: input, shape index: {}]   ;;  %s5938_s18 = inlined_call_operand.vmem [shape: bf16[64,128], index: 18, kind: input, shape index: {}]   ;;  %s5939_s19 = inlined_call_operand.vmem [shape: f32[1,128], index: 19, kind: input, shape index: {}]   ;;  %s5940_s20 = inlined_call_operand.vmem [shape: f32[2,4,128], index: 20, kind: output, shape index: {0}]   ;;  %s5941_s21 = inlined_call_operand.vmem [shape: f32[2,1,128], index: 21, kind: output, shape index: {1}]  }
   0x1   :  { %5943 = sst [smem:[#allocation5_spill]] %s5920_s0 }
   0x2   :  { %5944 = sst [smem:[#allocation6_spill]] %s5921_s1 }
   0x3   :  { %5945 = sst [smem:[#allocation7_spill]] %s5922_s2 }
   0x4   :  { %5946 = sst [smem:[#allocation8_spill]] %s5923_s3 }
   0x5   :  { %5947 = sst [smem:[#allocation9_spill]] %s5924_s4 }
   0x6   :  { %5948 = sst [smem:[#allocation10_spill]] %s5925_s5 }
   0x7   :  { %5949 = sst [smem:[#allocation11_spill]] %s5935_s15 }
   0x8   :  { %s5950_s26 = sld [smem:[#allocation5_spill]] }
   0xe   :  { %s27_s15 = sshll.u32 %s5950_s26, 4  ;;  %s28_s15 = int_to_ptr.vmem [resolvable:$true] %s27_s15 }
   0xf   :  { %s4897_s27 = scalar_lea.vmem %s28_s15, 16  ;;  %p4902_p1 = scmp.lt.s32.totalorder %s28_s15, %s28_s15 }
  0x10   :  { %p4898_p0 = scmp.ne.s32.totalorder %s28_s15, %s4897_s27  ;;  %p4903_p2 = scmp.lt.s32.totalorder %s4897_s27, %s4897_s27 }
  0x12   :  { %p4904_p3 = por %p4903_p2, %p4902_p1 }
  0x14   :  { %p4905_p4 = pnand %p4904_p3, %p4898_p0 }
  0x16   :  { %4908 = shalt.err (!%p4905_p4)  }
  0x17   :  { %s4919_s3 = smov [#allocation3]  }
  0x18   :  { %30 = dma.vmem_to_smem %s28_s15, 16, %s4919_s3, [#allocation2] }
  0x19   :  { %4913 = dma.done.wait [#allocation2], 16 }
  0x1a   :  { %4914 = vsyncadd [#allocation2], 4294967280 }
  0x1b   :  { %32 = sfence }
  0x1c   :  { %s5036_s28 = smov 0  }
  0x1d LB: > { %s5042_s29 = sadd.s32 4294967295, %s4917_s28   ;;  %p4175_p5 = scmp.ge.s32.totalorder %s4917_s28, 1  ;;  %s4917_s28 = sphi %s5036_s28, %s38_s28  }
  0x1e   : > { %p586_p6 = scmp.lt.s32.totalorder %s4917_s28, 3 }
  0x20   : > { %p587_p7 = pnand %p4175_p5, %p586_p6 }
  0x21   : > { %s5047_s15 = sshll.u32 (!%p587_p7), %s5042_s29, 2  ;;  %s5951_s22 = sld [smem:[#allocation6_spill]] (!%p587_p7) }
  0x22   : > { %590 = sbr.rel (%p587_p7) target bundleno = 3174 (0xc66), region = 96  ;;  %p654_p8 = scmp.lt.s32.totalorder (!%p587_p7), %s5047_s15, 7 }
  0x23   : > { %s5952_s2 = sld [smem:[#allocation7_spill]] (!%p587_p7)  ;;  %s681_s5 = sadd.s32 (!%p587_p7), 1, %s5047_s15 }
  0x24   : > { %s5953_s3 = sld [smem:[#allocation9_spill]] (!%p587_p7)  ;;  %s687_s1 = sadd.s32 (!%p587_p7), 3, %s5047_s15 }
  0x25   : > { %s5954_s30 = sld [smem:[#allocation8_spill]] (!%p587_p7)  ;;  %s684_s24 = sadd.s32 (!%p587_p7), 2, %s5047_s15 }
  0x26   : > { %p667_p9 = scmp.lt.s32.totalorder (!%p587_p7), %s5042_s29, 1 }
  0x27   : > { %v4920_v0 = vmov 0.0   ;;  %vm4921_vm0 = vmmov 0   ;;  %s655_s0 = scalar_select %p654_p8, %s5047_s15, 7  ;;  %vm738_vm1 = vcmask 130048   ;;  %vm1026_vm2 = vcmask 1041408  }
  0x28   : > { %4434 = vmatprep.subr.bf16.mxu1 %v4920_v0  ;;  %4436 = vmatprep.mubr.msk.bf16.mxu1 %vm4921_vm0, %v4920_v0  ;;  %vm1013_vm3 = vcmask 31744   ;;  %vm1406_vm12 = vcmask 261120   ;;  %vm2953_vm13 = vcmask 27648   ;;  %vm2966_vm14 = vcmask 1043456   ;;  %s5960_s29 = smov (!%p667_p9, %s5042_s29), 1 }
  0x29   : > { %4446 = vmatprep.subr.bf16.mxu0 %v4920_v0  ;;  %4448 = vmatprep.mubr.msk.bf16.mxu0 %vm4921_vm0, %v4920_v0  ;;  %s4305_s4 = sshll.u32 %s655_s0, 3  ;;  %vm4041_vm15 = vcmask 0  }
  0x2a   : > { %s658_s23 = scalar_lea.vmem %s5951_s22, %s4305_s4  ;;  %s665_s25 = scalar_lea.vmem %s5952_s2, %s4305_s4  ;;  %v1012_v25 = vld [vmem:[%s5953_s3] sm:$0x3] }
  0x2b   : > { %v4789_v1 = vld [vmem:[%s658_s23] sm:$0xff]   ;;  %v4791_v3 = vld [vmem:[%s658_s23 + $0x8] sm:$0xff]   ;;  %v4793_v6 = vld [vmem:[%s658_s23 + $0x10] sm:$0xff]   ;;  %v1028_v26 = vsel %vm1026_vm2, %v1012_v25, 0  ;;  %s682_s22 = sld [smem:[#allocation3 + %s681_s5]] }
  0x2c   : > { %v5063_v2 = vld [vmem:[%s665_s25] sm:$0xff]   ;;  %4435 = vmatpush3.bf16.msra.mxu1 %v4789_v1  ;;  %v5065_v4 = vld [vmem:[%s665_s25 + $0x8] sm:$0xff]   ;;  %v5077_v9 = vld [vmem:[%s665_s25 + $0x10] sm:$0xff]   ;;  %4447 = vmatpush3.bf16.msra.mxu0 %v4793_v6  ;;  %s5180_s2 = sld [smem:[#allocation3 + %s687_s1]]  ;;  %s4182_s1 = sshll.u32 %s5960_s29, 2 }
  0x2d   : > { %v5068_v5 = vunpack.c.l.bf16 %v5063_v2  ;;  %4440 = vmatprep.subr.bf16.mxu1 %v4920_v0  ;;  %v5072_v7 = vunpack.c.h.bf16 %v5063_v2  ;;  %v5075_v8 = vunpack.c.l.bf16 %v5065_v4  ;;  %v5082_v11 = vunpack.c.h.bf16 %v5065_v4  ;;  %v5086_v12 = vld [vmem:[%s665_s25 + $0x18] sm:$0xff]   ;;  %4770 = vmatprep.subr.msk.bf16.mxu0 %vm1026_vm2, %v1012_v25  ;;  %v1011_v27 = vld [vmem:[%s5954_s30] sm:$0x3]  ;;  %s5183_s25 = sld [smem:[#allocation3 + %s684_s24]]  ;;  %s670_s27 = scalar_lea.vmem %s5940_s20, %s4182_s1 }
  0x2e   : > { %v5091_v14 = vunpack.c.h.bf16 %v5077_v9  ;;  %v5096_v15 = vunpack.c.l.bf16 %v5077_v9  ;;  %v5099_v16 = vunpack.c.l.bf16 %v5086_v12  ;;  %v4794_v18 = vld [vmem:[%s658_s23 + $0x18] sm:$0xff]   ;;  %v5117_v23 = vunpack.c.h.bf16 %v5086_v12  ;;  %s679_s23 = sld [smem:[#allocation3 + %s5047_s15]] }
  0x2f   : > { %v739_v10 = vsel %vm738_vm1, %v5068_v5, 0.0  ;;  %4437 = vmatmul.mubr.msk.bf16.vlgmr.msra.gmra.mxu1 %vm738_vm1, %v5063_v2  ;;  %v745_v13 = vsel %vm738_vm1, %v5075_v8, 0.0  ;;  %v742_v17 = vsel %vm738_vm1, %v5072_v7, 0.0  ;;  %4449 = vmatmul.mubr.msk.bf16.vlgmr.msra.gmra.mxu0 %vm738_vm1, %v5077_v9  ;;  %v748_v19 = vsel %vm738_vm1, %v5082_v11, 0.0  ;;  %s5955_s3 = sld [smem:[#allocation10_spill]] }
  0x30   : > { %4441 = vmatpush3.bf16.msra.mxu1 %v4791_v3  ;;  %4442 = vmatprep.mubr.msk.bf16.mxu1 %vm4921_vm0, %v4920_v0  ;;  %v754_v20 = vsel %vm738_vm1, %v5091_v14, 0.0  ;;  %v751_v21 = vsel %vm738_vm1, %v5096_v15, 0.0  ;;  %v757_v22 = vsel %vm738_vm1, %v5099_v16, 0.0  ;;  %v760_v24 = vsel %vm738_vm1, %v5117_v23, 0.0 }
  0x31   : > { %4452 = vmatprep.subr.bf16.mxu1 %v4920_v0  ;;  %740 = vadd.xlane.f32.xlu0 %v739_v10  ;;  %v1108_v28 = vsel %vm1026_vm2, %v1011_v27, 0 }
  0x32   : > { %746 = vadd.xlane.f32.xlu1 %v745_v13  ;;  %4459 = vmatpush3.bf16.msra.mxu0 %v1028_v26 }
  0x33   : > { %4460 = vmatprep.mubr.msk.bf16.mxu0 %vm1013_vm3, %v4789_v1  ;;  %4478 = vmatprep.subr.bf16.mxu0 %v4920_v0 }
  0x35   : > { %743 = vadd.xlane.f32.xlu0 %v742_v17 }
  0x36   : > { %749 = vadd.xlane.f32.xlu1 %v748_v19 }
  0x37   : > { %4443 = vmatmul.mubr.msk.bf16.vlgmr.msra.gmra.mxu1 %vm738_vm1, %v5065_v4  ;;  %4461 = vmatmul.mubr.msk.bf16.vlgmr.msra.gmra.mxu0 %vm1013_vm3, %v4791_v3 }
  0x38   : > { %4453 = vmatpush3.bf16.msra.mxu1 %v4794_v18  ;;  %4454 = vmatprep.mubr.msk.bf16.mxu1 %vm4921_vm0, %v4920_v0 }
  0x39   : > { %752 = vadd.xlane.f32.xlu0 %v751_v21  ;;  %4464 = vmatprep.mubr.msk.bf16.mxu0 %vm1013_vm3, %v4793_v6 }
  0x3a   : > { %755 = vadd.xlane.f32.xlu1 %v754_v20  ;;  %4771 = vmatprep.subr.msk.bf16.mxu1 %vm1026_vm2, %v1011_v27 }
  0x3d   : > { %758 = vadd.xlane.f32.xlu0 %v757_v22 }
  0x3e   : > { %761 = vadd.xlane.f32.xlu1 %v760_v24 }
  0x3f   : > { %4455 = vmatmul.mubr.msk.bf16.vlgmr.msra.gmra.mxu1 %vm738_vm1, %v5086_v12  ;;  %4465 = vmatmul.mubr.msk.bf16.gmra.mxu0 %vm1013_vm3, %v4794_v18 }
  0x40   : > { %4469 = vmatpush3.bf16.msra.mxu1 %v1108_v28  ;;  %4480 = vmatprep.mubr.msk.bf16.mxu0 %vm4921_vm0, %v4920_v0 }
  0x41   : > { %4484 = vmatprep.subr.bf16.mxu1 %v4920_v0 }
  0xba   : > { %v741_v30 = vpop.xlane.xlu0 %740 }
  0xbb   : > { %v747_v29 = vpop.xlane.xlu1 %746  ;;  %v763_v33 = vmax.f32 %v741_v30, 1.0 }
  0xbc   : > { %v765_v39 = vmax.f32 %v747_v29, 1.0 }
  0xbd   : > { %4825 = vrcp.f32 %v763_v33 }
  0xbe   : > { %v744_v32 = vpop.xlane.xlu0 %743 }
  0xbf   : > { %v750_v31 = vpop.xlane.xlu1 %749  ;;  %v764_v34 = vmax.f32 %v744_v32, 1.0  ;;  %v676_v32 = vlaneseq }
  0xc0   : > { %v766_v40 = vmax.f32 %v750_v31, 1.0 }
  0xc1   : > { %4827 = vrcp.f32 %v764_v34  ;;  %v5178_v34 = vshrl.u32 %v676_v32, 7 }
  0xc2   : > { %v753_v36 = vpop.xlane.xlu0 %752 }
  0xc3   : > { %v756_v35 = vpop.xlane.xlu1 %755  ;;  %v767_v37 = vmax.f32 %v753_v36, 1.0  ;;  %v683_v36 = vstv %s682_s22 }
  0xc4   : > { %v768_v38 = vmax.f32 %v756_v35, 1.0  ;;  %vm692_vm4 = vcmp.lt.s32.totalorder %v5178_v34, %v683_v36 }
  0xc5   : > { %4829 = vrcp.f32 %v767_v37  ;;  %v678_v37 = vadd.s32 8, %v5178_v34 }
  0xc6   : > { %4831 = vrcp.f32 %v768_v38  ;;  %v759_v41 = vpop.xlane.xlu0 %758 }
  0xc7   : > { %4833 = vrcp.f32 %v765_v39  ;;  %v762_v42 = vpop.xlane.xlu1 %761  ;;  %v769_v44 = vmax.f32 %v759_v41, 1.0  ;;  %v4212_v39 = vld [vmem:[%s5955_s3] ss:$0 sm:$0xff]  ;;  %vm693_vm6 = vcmp.lt.s32.totalorder %v678_v37, %v683_v36 }
  0xc8   : > { %4835 = vrcp.f32 %v766_v40  ;;  %v770_v46 = vmax.f32 %v762_v42, 1.0  ;;  %v680_v40 = vstv %s679_s23  ;;  %s673_s23 = scalar_lea.vmem %s5941_s21, %s5960_s29 }
  0xc9   : > { %4837 = vrcp.f32 %v769_v44  ;;  %vm690_vm5 = vcmp.lt.s32.totalorder %v5178_v34, %v680_v40  ;;  %vm691_vm7 = vcmp.lt.s32.totalorder %v678_v37, %v680_v40 }
  0xca   : > { %v5143_v45 = vpop.eup %4825  ;;  %4839 = vrcp.f32 %v770_v46 }
  0xce   : > { %v5145_v47 = vpop.eup %4827 }
  0xd2   : > { %v5149_v54 = vpop.eup %4829 }
  0xd3   : > { %v5151_v56 = vpop.eup %4831 }
  0xd4   : > { %v5153_v60 = vpop.eup %4833 }
  0xd5   : > { %v5156_v62 = vpop.eup %4835 }
  0xd6   : > { %v5162_v21 = vpop.eup %4837 }
  0xd7   : > { %v5165_v22 = vpop.eup %4839 }
  0xef   : > { %v827_v43 = vpop.f32.mrf.mxu1  ;;  %v937_v49 = vpop.f32.mrf.mxu0 }
  0xf0   : > { %v999_v51 = vmul.f32 %v5143_v45, %v827_v43  ;;  %v1003_v1 = vmul.f32 %v5149_v54, %v937_v49 }
  0xf1   : > { %v4438_v48 = vpop.f32.mrf.mxu1  ;;  %v4450_v53 = vpop.f32.mrf.mxu0 }
  0xf2   : > { %v5191_v48 = vsel %vm692_vm4, 1.0, %v4920_v0  ;;  %v5195_v53 = vsel %vm690_vm5, 1.0, %v4920_v0  ;;  %vm3965_vm5 = vcmask 1042434  }
  0xf3   : > { %v830_v50 = vpop.f32.mrf.mxu1  ;;  %v940_v58 = vpop.f32.mrf.mxu0 }
  0xf4   : > { %v1000_v52 = vmul.f32 %v5145_v47, %v830_v50  ;;  %v1004_v3 = vmul.f32 %v5151_v56, %v940_v58 }
  0xf5   : > { %v4439_v55 = vpop.f32.mrf.mxu1  ;;  %v4451_v61 = vpop.f32.mrf.mxu0 }
  0xf6   : > { %v1007_v57 = vpack.c.bf16 %v1000_v52, %v999_v51  ;;  %v1009_v18 = vpack.c.bf16 %v1004_v3, %v1003_v1  ;;  %v689_v52 = vstv %s5180_s2  ;;  %v5198_v55 = vsel %vm693_vm6, 1.0, %v4920_v0 }
  0xf7   : > { %v882_v59 = vpop.f32.mrf.mxu1  ;;  %v4462_v30 = vpop.f32.mrf.mxu0  ;;  %v686_v1 = vstv %s5183_s25  ;;  %v5203_v3 = vsel %vm691_vm7, 1.0, %v4920_v0  ;;  %vm696_vm8 = vcmp.lt.s32.totalorder %v5178_v34, %v689_v52  ;;  %vm697_vm10 = vcmp.lt.s32.totalorder %v678_v37, %v689_v52 }
  0xf8   : > { %4470 = vmatprep.mubr.msk.bf16.mxu1 %vm1013_vm3, %v1007_v57  ;;  %v1001_v10 = vmul.f32 %v5153_v60, %v882_v59  ;;  %vm5209_vm9 = vcmp.lt.s32.totalorder %v5178_v34, %v686_v1  ;;  %vm695_vm11 = vcmp.lt.s32.totalorder %v678_v37, %v686_v1  ;;  %vm3967_vm6 = vcmask 1043459  }
  0xf9   : > { %v4444_v63 = vpop.f32.mrf.mxu1  ;;  %v1064_v31 = vpop.f32.mrf.mxu0  ;;  %v5220_v40 = vsel %vm5209_vm9, 1.0, %v4920_v0 }
  0xfb   : > { %v885_v6 = vpop.f32.mrf.mxu1  ;;  %v4463_v33 = vpop.f32.mrf.mxu0 }
  0xfc   : > { %v1002_v13 = vmul.f32 %v5156_v62, %v885_v6 }
  0xfd   : > { %v4445_v17 = vpop.f32.mrf.mxu1  ;;  %v1067_v35 = vpop.f32.mrf.mxu0 }
  0xfe   : > { %v1008_v19 = vpack.c.bf16 %v1002_v13, %v1001_v10 }
  0xff   : > { %v992_v20 = vpop.f32.mrf.mxu1  ;;  %v4466_v43 = vpop.f32.mrf.mxu0 }
 0x100   : > { %4471 = vmatmul.mubr.msk.bf16.vlgmr.msra.gmra.mxu1 %vm1013_vm3, %v1008_v19  ;;  %v1005_v26 = vmul.f32 %v5162_v21, %v992_v20  ;;  %v4800_v19 = vld [vmem:[%s5926_s6] sm:$0xff]  }
 0x101   : > { %v4456_v24 = vpop.f32.mrf.mxu1  ;;  %4474 = vmatprep.mubr.msk.bf16.mxu1 %vm1013_vm3, %v1009_v18  ;;  %v1080_v58 = vpop.f32.mrf.mxu0 }
 0x103   : > { %v995_v25 = vpop.f32.mrf.mxu1  ;;  %v4467_v24 = vpop.f32.mrf.mxu0 }
 0x104   : > { %v1006_v27 = vmul.f32 %v5165_v22, %v995_v25 }
 0x105   : > { %v4457_v28 = vpop.f32.mrf.mxu1 }
 0x106   : > { %v1010_v29 = vpack.c.bf16 %v1006_v27, %v1005_v26 }
 0x108   : > { %4475 = vmatmul.mubr.msk.bf16.gmra.mxu1 %vm1013_vm3, %v1010_v29  ;;  %v5215_v29 = vsel %vm696_vm8, 1.0, %v4920_v0 }
 0x109   : > { %4486 = vmatprep.mubr.msk.bf16.mxu1 %vm4921_vm0, %v4920_v0 }
 0x1c0   : > { %v4472_v38 = vpop.f32.mrf.mxu1 }
 0x1c1   : > { %v1153_v41 = vadd.f32 %v4472_v38, %v4462_v30 }
 0x1c2   : > { %v1144_v42 = vpop.f32.mrf.mxu1 }
 0x1c3   : > { %v1184_v44 = vadd.f32 %v4212_v39, %v1153_v41  ;;  %v1145_v46 = vadd.f32 %v1144_v42, %v1064_v31  ;;  %v1083_v42 = vpop.f32.mrf.mxu0 }
 0x1c4   : > { %v4473_v49 = vpop.f32.mrf.mxu1 }
 0x1c5   : > { %v1182_v50 = vadd.f32 %v4212_v39, %v1145_v46  ;;  %v1156_v51 = vadd.f32 %v4473_v49, %v4463_v33  ;;  %v1192_v59 = vmul.f32 %v5191_v48, %v1184_v44  ;;  %v5223_v46 = vsel %vm697_vm10, 1.0, %v4920_v0 }
 0x1c6   : > { %v1147_v57 = vpop.f32.mrf.mxu1 }
 0x1c7   : > { %v1185_v61 = vadd.f32 %v4212_v39, %v1156_v51  ;;  %v1148_v63 = vadd.f32 %v1147_v57, %v1067_v35  ;;  %v1190_v10 = vmul.f32 %v5195_v53, %v1182_v50  ;;  %v1200_v25 = vmax.f32 %v1192_v59, 0.0 }
 0x1c8   : > { %v4476_v6 = vpop.f32.mrf.mxu1  ;;  %v5227_v51 = vsel %vm695_vm11, 1.0, %v4920_v0 }
 0x1c9   : > { %v1193_v13 = vmul.f32 %v5198_v55, %v1185_v61  ;;  %v1183_v17 = vadd.f32 %v4212_v39, %v1148_v63  ;;  %v1169_v18 = vadd.f32 %v4476_v6, %v4466_v43  ;;  %v1198_v33 = vmax.f32 %v1190_v10, 0.0  ;;  %v4797_v10 = vld [vmem:[%s5927_s7 + $0x8] sm:$0xff]  }
 0x1ca   : > { %v1160_v20 = vpop.f32.mrf.mxu1 }
 0x1cb   : > { %v1201_v26 = vmax.f32 %v1193_v13, 0.0  ;;  %v1191_v27 = vmul.f32 %v5203_v3, %v1183_v17  ;;  %v1161_v28 = vadd.f32 %v1160_v20, %v1080_v58  ;;  %v1188_v30 = vadd.f32 %v4212_v39, %v1169_v18  ;;  %v4798_v17 = vld [vmem:[%s5927_s7] sm:$0xff]   ;;  %v4799_v18 = vld [vmem:[%s5926_s6 + $0x8] sm:$0xff]  }
 0x1cc   : > { %v4477_v31 = vpop.f32.mrf.mxu1 }
 0x1cd   : > { %v1207_v35 = vpack.c.bf16 %v1201_v26, %v1200_v25  ;;  %v1199_v36 = vmax.f32 %v1191_v27, 0.0  ;;  %v1186_v38 = vadd.f32 %v4212_v39, %v1161_v28  ;;  %v1172_v41 = vadd.f32 %v4477_v31, %v4467_v24 }
 0x1ce   : > { %v1163_v43 = vpop.f32.mrf.mxu1  ;;  %v1196_v37 = vmul.f32 %v5215_v29, %v1188_v30 }
 0x1cf   : > { %v1206_v44 = vpack.c.bf16 %v1199_v36, %v1198_v33  ;;  %v1164_v49 = vadd.f32 %v1163_v43, %v1083_v42  ;;  %4485 = vmatpush3.bf16.msra.mxu1 %v1207_v35  ;;  %v1189_v50 = vadd.f32 %v4212_v39, %v1172_v41  ;;  %v1194_v52 = vmul.f32 %v5220_v40, %v1186_v38 }
 0x1d0   : > { %4496 = vmatprep.subr.bf16.mxu1 %v4920_v0  ;;  %v1204_v61 = vmax.f32 %v1196_v37, 0.0 }
 0x1d1   : > { %v1187_v57 = vadd.f32 %v4212_v39, %v1164_v49  ;;  %4479 = vmatpush3.bf16.msra.mxu0 %v1206_v44  ;;  %v1197_v58 = vmul.f32 %v5223_v46, %v1189_v50  ;;  %v1202_v1 = vmax.f32 %v1194_v52, 0.0 }
 0x1d2   : > { %4487 = vmatmul.mubr.msk.bf16.vlgmr.msra.gmra.mxu1 %vm738_vm1, %v5065_v4  ;;  %4490 = vmatprep.subr.bf16.mxu0 %v4920_v0 }
 0x1d3   : > { %v1195_v59 = vmul.f32 %v5227_v51, %v1187_v57  ;;  %4498 = vmatprep.mubr.msk.bf16.mxu1 %vm4921_vm0, %v4920_v0  ;;  %v1205_v63 = vmax.f32 %v1197_v58, 0.0 }
 0x1d4   : > { %4481 = vmatmul.mubr.msk.bf16.vlgmr.msra.gmra.mxu0 %vm738_vm1, %v5063_v2 }
 0x1d5   : > { %v1203_v39 = vmax.f32 %v1195_v59, 0.0  ;;  %4492 = vmatprep.mubr.msk.bf16.mxu0 %vm4921_vm0, %v4920_v0  ;;  %v1209_v6 = vpack.c.bf16 %v1205_v63, %v1204_v61 }
 0x1d7   : > { %v1208_v13 = vpack.c.bf16 %v1203_v39, %v1202_v1  ;;  %4497 = vmatpush3.bf16.msra.mxu1 %v1209_v6 }
 0x1d8   : > { %4514 = vmatprep.subr.bf16.mxu1 %v4799_v18 }
 0x1d9   : > { %4491 = vmatpush3.bf16.msra.mxu0 %v1208_v13 }
 0x1da   : > { %4502 = vmatprep.subr.bf16.mxu0 %v4797_v10  ;;  %4499 = vmatmul.mubr.msk.bf16.vlgmr.msra.gmra.mxu1 %vm738_vm1, %v5086_v12 }
 0x1db   : > { %4515 = vmatpush3.bf16.msra.mxu1 %v4799_v18 }
 0x1dc   : > { %4493 = vmatmul.mubr.msk.bf16.vlgmr.msra.gmra.mxu0 %vm738_vm1, %v5077_v9  ;;  %4516 = vmatprep.subr.bf16.mxu1 %v4800_v19 }
 0x1dd   : > { %4503 = vmatpush3.bf16.msra.mxu0 %v4797_v10  ;;  %4506 = vmatprep.mubr.msk.bf16.mxu0 %vm1406_vm12, %v1206_v44 }
 0x1de   : > { %4504 = vmatprep.subr.bf16.mxu0 %v4798_v17 }
 0x1df   : > { %4517 = vmatpush3.bf16.msra.mxu1 %v4800_v19 }
 0x1e0   : > { %4532 = vmatprep.subr.bf16.mxu1 %v4920_v0 }
 0x1e1   : > { %4505 = vmatpush3.bf16.msra.mxu0 %v4798_v17 }
 0x1e2   : > { %4526 = vmatprep.subr.bf16.mxu0 %v4920_v0 }
 0x1e4   : > { %4507 = vmatmul.mubr.msk.bf16.vlgmr.msra.gmra.mxu0 %vm1406_vm12, %v1207_v35 }
 0x1e5   : > { %4510 = vmatprep.mubr.msk.bf16.mxu0 %vm1406_vm12, %v1208_v13 }
 0x1ec   : > { %4511 = vmatmul.mubr.msk.bf16.gmra.mxu0 %vm1406_vm12, %v1209_v6 }
 0x1ed   : > { %4528 = vmatprep.mubr.msk.bf16.mxu0 %vm4921_vm0, %v4920_v0 }
 0x292   : > { %v1285_v20 = vpop.f32.mrf.mxu1 }
 0x293   : > { %v1376_v36 = vmul.f32 %v5153_v60, %v1285_v20  ;;  %v4229_v20 = vld [vmem:[%s5928_s8] ss:$0 sm:$0xff] }
 0x294   : > { %v1244_v24 = vpop.f32.mrf.mxu0  ;;  %v4488_v25 = vpop.f32.mrf.mxu1 }
 0x295   : > { %v1374_v33 = vmul.f32 %v5143_v45, %v1244_v24 }
 0x296   : > { %v4482_v26 = vpop.f32.mrf.mxu0  ;;  %v1288_v27 = vpop.f32.mrf.mxu1 }
 0x297   : > { %v1377_v28 = vmul.f32 %v5156_v62, %v1288_v27 }
 0x298   : > { %v1247_v30 = vpop.f32.mrf.mxu0  ;;  %v4489_v31 = vpop.f32.mrf.mxu1 }
 0x299   : > { %v1375_v35 = vmul.f32 %v5145_v47, %v1247_v30  ;;  %v1383_v43 = vpack.c.bf16 %v1377_v28, %v1376_v36 }
 0x29a   : > { %v4483_v38 = vpop.f32.mrf.mxu0  ;;  %v1367_v42 = vpop.f32.mrf.mxu1 }
 0x29b   : > { %v1382_v41 = vpack.c.bf16 %v1375_v35, %v1374_v33  ;;  %v1380_v63 = vmul.f32 %v5162_v21, %v1367_v42 }
 0x29c   : > { %v1326_v44 = vpop.f32.mrf.mxu0  ;;  %v4500_v49 = vpop.f32.mrf.mxu1 }
 0x29d   : > { %4518 = vmatprep.mubr.msk.bf16.mxu1 %vm1406_vm12, %v1382_v41  ;;  %v1378_v58 = vmul.f32 %v5149_v54, %v1326_v44 }
 0x29e   : > { %v4494_v37 = vpop.f32.mrf.mxu0  ;;  %4519 = vmatmul.mubr.msk.bf16.vlgmr.msra.gmra.mxu1 %vm1406_vm12, %v1383_v43  ;;  %v1370_v50 = vpop.f32.mrf.mxu1 }
 0x29f   : > { %v1381_v52 = vmul.f32 %v5165_v22, %v1370_v50 }
 0x2a0   : > { %v1329_v57 = vpop.f32.mrf.mxu0  ;;  %v4501_v61 = vpop.f32.mrf.mxu1 }
 0x2a1   : > { %v1379_v59 = vmul.f32 %v5151_v56, %v1329_v57  ;;  %v1385_v6 = vpack.c.bf16 %v1381_v52, %v1380_v63 }
 0x2a2   : > { %v4495_v1 = vpop.f32.mrf.mxu0 }
 0x2a3   : > { %v1384_v39 = vpack.c.bf16 %v1379_v59, %v1378_v58 }
 0x2a4   : > { %v4508_v10 = vpop.f32.mrf.mxu0 }
 0x2a5   : > { %4522 = vmatprep.mubr.msk.bf16.mxu1 %vm1406_vm12, %v1384_v39 }
 0x2a6   : > { %4523 = vmatmul.mubr.msk.bf16.gmra.mxu1 %vm1406_vm12, %v1385_v6  ;;  %v1453_v13 = vpop.f32.mrf.mxu0 }
 0x2a7   : > { %4534 = vmatprep.mubr.msk.bf16.mxu1 %vm4921_vm0, %v4920_v0 }
 0x2a8   : > { %v4509_v17 = vpop.f32.mrf.mxu0 }
 0x2aa   : > { %v1456_v18 = vpop.f32.mrf.mxu0 }
 0x2ac   : > { %v4512_v25 = vpop.f32.mrf.mxu0 }
 0x2ae   : > { %v1469_v35 = vpop.f32.mrf.mxu0 }
 0x2b0   : > { %v4513_v50 = vpop.f32.mrf.mxu0 }
 0x35e   : > { %v4520_v19 = vpop.f32.mrf.mxu1 }
 0x35f   : > { %v1551_v24 = vadd.f32 %v4520_v19, %v4508_v10  ;;  %v1472_v19 = vpop.f32.mrf.mxu0 }
 0x360   : > { %v1542_v26 = vpop.f32.mrf.mxu1 }
 0x361   : > { %v1582_v27 = vadd.f32 %v4229_v20, %v1551_v24  ;;  %v1543_v28 = vadd.f32 %v1542_v26, %v1453_v13 }
 0x362   : > { %v4521_v30 = vpop.f32.mrf.mxu1 }
 0x363   : > { %v1580_v31 = vadd.f32 %v4229_v20, %v1543_v28  ;;  %v1554_v33 = vadd.f32 %v4521_v30, %v4509_v17  ;;  %v1590_v36 = vmul.f32 %v5191_v48, %v1582_v27 }
 0x364   : > { %v1545_v38 = vpop.f32.mrf.mxu1 }
 0x365   : > { %v1583_v41 = vadd.f32 %v4229_v20, %v1554_v33  ;;  %v1546_v42 = vadd.f32 %v1545_v38, %v1456_v18  ;;  %v5285_v43 = vmul.f32 %v5195_v53, %v1580_v31  ;;  %v1598_v52 = vmax.f32 %v1590_v36, 0.0 }
 0x366   : > { %v4524_v44 = vpop.f32.mrf.mxu1 }
 0x367   : > { %v1591_v49 = vmul.f32 %v5198_v55, %v1583_v41  ;;  %v1581_v37 = vadd.f32 %v4229_v20, %v1546_v42  ;;  %v1567_v57 = vadd.f32 %v4524_v44, %v4512_v25  ;;  %v1596_v1 = vmax.f32 %v5285_v43, 0.0 }
 0x368   : > { %v1558_v58 = vpop.f32.mrf.mxu1  ;;  %v5294_v24 = vmul.f32 %v5191_v48, %v1598_v52 }
 0x369   : > { %v1599_v59 = vmax.f32 %v1591_v49, 0.0  ;;  %v1589_v61 = vmul.f32 %v5203_v3, %v1581_v37  ;;  %v1559_v63 = vadd.f32 %v1558_v58, %v1469_v35  ;;  %v1586_v39 = vadd.f32 %v4229_v20, %v1567_v57 }
 0x36a   : > { %v4525_v6 = vpop.f32.mrf.mxu1 }
 0x36b   : > { %v1605_v10 = vpack.c.bf16 %v1599_v59, %v1598_v52  ;;  %v5291_v13 = vmul.f32 %v5198_v55, %v1599_v59  ;;  %v1597_v17 = vmax.f32 %v1589_v61, 0.0  ;;  %v1584_v18 = vadd.f32 %v4229_v20, %v1559_v63  ;;  %v4801_v52 = vld [vmem:[%s5930_s10 + $0x8] sm:$0xff]  }
 0x36c   : > { %v1594_v25 = vmul.f32 %v5215_v29, %v1586_v39  ;;  %v1570_v26 = vadd.f32 %v4525_v6, %v4513_v50  ;;  %v1561_v27 = vpop.f32.mrf.mxu1  ;;  %v4802_v39 = vld [vmem:[%s5930_s10] sm:$0xff]  }
 0x36d   : > { %v1604_v28 = vpack.c.bf16 %v1597_v17, %v1596_v1  ;;  %v1592_v30 = vmul.f32 %v5220_v40, %v1584_v18  ;;  %v1562_v31 = vadd.f32 %v1561_v27, %v1472_v19  ;;  %4533 = vmatpush3.bf16.msra.mxu1 %v1605_v10  ;;  %v2102_v35 = vpack.c.bf16 %v5291_v13, %v5294_v24 }
 0x36e   : > { %v1587_v33 = vadd.f32 %v4229_v20, %v1570_v26  ;;  %4544 = vmatprep.subr.bf16.mxu1 %v4920_v0  ;;  %v1602_v38 = vmax.f32 %v1594_v25, 0.0  ;;  %v2090_v6 = vmul.f32 %v5203_v3, %v1597_v17  ;;  %v2089_v18 = vmul.f32 %v5195_v53, %v1596_v1  ;;  %v4803_v1 = vld [vmem:[%s5929_s9 + $0x8] sm:$0xff]  }
 0x36f   : > { %v1585_v36 = vadd.f32 %v4229_v20, %v1562_v31  ;;  %4527 = vmatpush3.bf16.msra.mxu0 %v1604_v28  ;;  %v1600_v42 = vmax.f32 %v1592_v30, 0.0 }
 0x370   : > { %v1595_v41 = vmul.f32 %v5223_v46, %v1587_v33  ;;  %4535 = vmatmul.mubr.msk.bf16.vlgmr.msra.gmra.mxu1 %vm738_vm1, %v5065_v4  ;;  %4538 = vmatprep.subr.bf16.mxu0 %v4920_v0  ;;  %v5313_v49 = vmul.f32 %v5215_v29, %v1602_v38  ;;  %v2101_v19 = vpack.c.bf16 %v2090_v6, %v2089_v18 }
 0x371   : > { %v1593_v43 = vmul.f32 %v5227_v51, %v1585_v36  ;;  %4546 = vmatprep.mubr.msk.bf16.mxu1 %vm4921_vm0, %v4920_v0  ;;  %v5322_v57 = vmul.f32 %v5220_v40, %v1600_v42 }
 0x372   : > { %v1603_v44 = vmax.f32 %v1595_v41, 0.0  ;;  %4529 = vmatmul.mubr.msk.bf16.vlgmr.msra.gmra.mxu0 %vm738_vm1, %v5063_v2 }
 0x373   : > { %v1601_v20 = vmax.f32 %v1593_v43, 0.0  ;;  %4540 = vmatprep.mubr.msk.bf16.mxu0 %vm4921_vm0, %v4920_v0 }
 0x374   : > { %v1607_v37 = vpack.c.bf16 %v1603_v44, %v1602_v38  ;;  %v5316_v50 = vmul.f32 %v5223_v46, %v1603_v44 }
 0x375   : > { %v1606_v58 = vpack.c.bf16 %v1601_v20, %v1600_v42  ;;  %v5325_v59 = vmul.f32 %v5227_v51, %v1601_v20 }
 0x376   : > { %4545 = vmatpush3.bf16.msra.mxu1 %v1607_v37  ;;  %v2104_v61 = vpack.c.bf16 %v5316_v50, %v5313_v49 }
 0x377   : > { %4539 = vmatpush3.bf16.msra.mxu0 %v1606_v58  ;;  %v2103_v63 = vpack.c.bf16 %v5325_v59, %v5322_v57  ;;  %4562 = vmatprep.subr.bf16.mxu1 %v4803_v1 }
 0x378   : > { %4550 = vmatprep.subr.bf16.mxu0 %v4801_v52 }
 0x379   : > { %4547 = vmatmul.mubr.msk.bf16.vlgmr.msra.gmra.mxu1 %vm738_vm1, %v5086_v12 }
 0x37a   : > { %4541 = vmatmul.mubr.msk.bf16.vlgmr.msra.gmra.mxu0 %vm738_vm1, %v5077_v9  ;;  %4563 = vmatpush3.bf16.msra.mxu1 %v4803_v1 }
 0x37b   : > { %4551 = vmatpush3.bf16.msra.mxu0 %v4801_v52  ;;  %4554 = vmatprep.mubr.msk.bf16.mxu0 %vm1406_vm12, %v1604_v28 }
 0x37c   : > { %4552 = vmatprep.subr.bf16.mxu0 %v4802_v39 }
 0x37f   : > { %4553 = vmatpush3.bf16.msra.mxu0 %v4802_v39 }
 0x380   : > { %4574 = vmatprep.subr.bf16.mxu0 %v4920_v0 }
 0x382   : > { %4555 = vmatmul.mubr.msk.bf16.vlgmr.msra.gmra.mxu0 %vm1406_vm12, %v1605_v10  ;;  %v4804_v10 = vld [vmem:[%s5929_s9] sm:$0xff]  }
 0x383   : > { %4558 = vmatprep.mubr.msk.bf16.mxu0 %vm1406_vm12, %v1606_v58  ;;  %4575 = vmatpush3.bf16.msra.mxu0 %v2101_v19 }
 0x384   : > { %4586 = vmatprep.subr.bf16.mxu0 %v4920_v0  ;;  %4564 = vmatprep.subr.bf16.mxu1 %v4804_v10 }
 0x385   : > { %4565 = vmatpush3.bf16.msra.mxu1 %v4804_v10 }
 0x386   : > { %4580 = vmatprep.subr.bf16.mxu1 %v4920_v0 }
 0x38a   : > { %4559 = vmatmul.mubr.msk.bf16.gmra.mxu0 %vm1406_vm12, %v1607_v37 }
 0x38b   : > { %4576 = vmatprep.mubr.msk.bf16.mxu0 %vm4921_vm0, %v4920_v0 }
 0x430   : > { %v1683_v17 = vpop.f32.mrf.mxu1 }
 0x431   : > { %v1774_v41 = vmul.f32 %v5153_v60, %v1683_v17 }
 0x432   : > { %v1642_v25 = vpop.f32.mrf.mxu0  ;;  %v4536_v26 = vpop.f32.mrf.mxu1 }
 0x433   : > { %v1772_v36 = vmul.f32 %v5143_v45, %v1642_v25 }
 0x434   : > { %v4530_v27 = vpop.f32.mrf.mxu0  ;;  %v1686_v28 = vpop.f32.mrf.mxu1 }
 0x435   : > { %v1775_v30 = vmul.f32 %v5156_v62, %v1686_v28 }
 0x436   : > { %v1645_v31 = vpop.f32.mrf.mxu0  ;;  %v4537_v33 = vpop.f32.mrf.mxu1 }
 0x437   : > { %v1773_v38 = vmul.f32 %v5145_v47, %v1645_v31  ;;  %v1781_v20 = vpack.c.bf16 %v1775_v30, %v1774_v41 }
 0x438   : > { %v4531_v42 = vpop.f32.mrf.mxu0 }
 0x439   : > { %v1780_v43 = vpack.c.bf16 %v1773_v38, %v1772_v36  ;;  %v1765_v44 = vpop.f32.mrf.mxu1 }
 0x43a   : > { %v1724_v37 = vpop.f32.mrf.mxu0  ;;  %v1778_v18 = vmul.f32 %v5162_v21, %v1765_v44 }
 0x43b   : > { %v4548_v52 = vpop.f32.mrf.mxu1  ;;  %4566 = vmatprep.mubr.msk.bf16.mxu1 %vm1406_vm12, %v1780_v43  ;;  %v1776_v60 = vmul.f32 %v5149_v54, %v1724_v37 }
 0x43c   : > { %v4542_v58 = vpop.f32.mrf.mxu0  ;;  %4567 = vmatmul.mubr.msk.bf16.vlgmr.msra.gmra.mxu1 %vm1406_vm12, %v1781_v20 }
 0x43d   : > { %v1768_v62 = vpop.f32.mrf.mxu1  ;;  %4581 = vmatpush3.bf16.msra.mxu1 %v2102_v35 }
 0x43e   : > { %v1779_v45 = vmul.f32 %v5165_v22, %v1768_v62  ;;  %v1727_v47 = vpop.f32.mrf.mxu0  ;;  %4592 = vmatprep.subr.bf16.mxu1 %v4920_v0 }
 0x43f   : > { %v1777_v39 = vmul.f32 %v5151_v56, %v1727_v47  ;;  %v4549_v6 = vpop.f32.mrf.mxu1  ;;  %v4246_v56 = vld [vmem:[%s5931_s11] ss:$0 sm:$0xff] }
 0x440   : > { %v4543_v19 = vpop.f32.mrf.mxu0  ;;  %v1783_v10 = vpack.c.bf16 %v1779_v45, %v1778_v18 }
 0x441   : > { %v1782_v1 = vpack.c.bf16 %v1777_v39, %v1776_v60 }
 0x442   : > { %v4556_v22 = vpop.f32.mrf.mxu0 }
 0x443   : > { %4570 = vmatprep.mubr.msk.bf16.mxu1 %vm1406_vm12, %v1782_v1 }
 0x444   : > { %4571 = vmatmul.mubr.msk.bf16.gmra.mxu1 %vm1406_vm12, %v1783_v10  ;;  %v1850_v13 = vpop.f32.mrf.mxu0 }
 0x445   : > { %4582 = vmatprep.mubr.msk.bf16.mxu1 %vm4921_vm0, %v4920_v0 }
 0x446   : > { %v4557_v24 = vpop.f32.mrf.mxu0 }
 0x448   : > { %v1853_v35 = vpop.f32.mrf.mxu0 }
 0x44a   : > { %v4560_v17 = vpop.f32.mrf.mxu0 }
 0x44c   : > { %v1866_v36 = vpop.f32.mrf.mxu0 }
 0x44e   : > { %v4561_v62 = vpop.f32.mrf.mxu0 }
 0x4fc   : > { %v4568_v54 = vpop.f32.mrf.mxu1 }
 0x4fd   : > { %v1948_v21 = vadd.f32 %v4568_v54, %v4556_v22  ;;  %v1869_v22 = vpop.f32.mrf.mxu0 }
 0x4fe   : > { %v1939_v25 = vpop.f32.mrf.mxu1 }
 0x4ff   : > { %v1979_v26 = vadd.f32 %v4246_v56, %v1948_v21  ;;  %v1940_v27 = vadd.f32 %v1939_v25, %v1850_v13 }
 0x500   : > { %v4569_v28 = vpop.f32.mrf.mxu1 }
 0x501   : > { %v1977_v30 = vadd.f32 %v4246_v56, %v1940_v27  ;;  %v1951_v31 = vadd.f32 %v4569_v28, %v4557_v24  ;;  %v1987_v33 = vmul.f32 %v5191_v48, %v1979_v26 }
 0x502   : > { %v1942_v38 = vpop.f32.mrf.mxu1 }
 0x503   : > { %v1980_v41 = vadd.f32 %v4246_v56, %v1951_v31  ;;  %v1943_v42 = vadd.f32 %v1942_v38, %v1853_v35  ;;  %v1999_v43 = vsel %vm1013_vm3, %v1987_v33, -inf  ;;  %v1985_v44 = vmul.f32 %v5195_v53, %v1977_v30 }
 0x504   : > { %v4572_v20 = vpop.f32.mrf.mxu1  ;;  %2000 = vmax.xlane.f32.xlu0 %v1999_v43 }
 0x505   : > { %v1978_v37 = vadd.f32 %v4246_v56, %v1943_v42  ;;  %v1964_v52 = vadd.f32 %v4572_v20, %v4560_v17  ;;  %v1988_v58 = vmul.f32 %v5198_v55, %v1980_v41  ;;  %v1993_v60 = vsel %vm1013_vm3, %v1985_v44, -inf }
 0x506   : > { %v1955_v45 = vpop.f32.mrf.mxu1 }
 0x507   : > { %v1956_v47 = vadd.f32 %v1955_v45, %v1866_v36  ;;  %v2002_v39 = vsel %vm1013_vm3, %v1988_v58, -inf  ;;  %v1986_v6 = vmul.f32 %v5203_v3, %v1978_v37  ;;  %v1983_v19 = vadd.f32 %v4246_v56, %v1964_v52 }
 0x508   : > { %v4573_v18 = vpop.f32.mrf.mxu1  ;;  %1994 = vmax.xlane.f32.xlu0 %v1993_v60  ;;  %2003 = vmax.xlane.f32.xlu1 %v2002_v39 }
 0x509   : > { %v1981_v1 = vadd.f32 %v4246_v56, %v1956_v47  ;;  %v1967_v10 = vadd.f32 %v4573_v18, %v4561_v62  ;;  %v1996_v35 = vsel %vm1013_vm3, %v1986_v6, -inf  ;;  %v1991_v26 = vmul.f32 %v5215_v29, %v1983_v19 }
 0x50a   : > { %v1958_v13 = vpop.f32.mrf.mxu1 }
 0x50b   : > { %v1959_v24 = vadd.f32 %v1958_v13, %v1869_v22  ;;  %v1989_v54 = vmul.f32 %v5220_v40, %v1981_v1  ;;  %v1984_v21 = vadd.f32 %v4246_v56, %v1967_v10  ;;  %v2011_v28 = vsel %vm1013_vm3, %v1991_v26, -inf }
 0x50c   : > { %1997 = vmax.xlane.f32.xlu1 %v1996_v35 }
 0x50d   : > { %v1982_v17 = vadd.f32 %v4246_v56, %v1959_v24  ;;  %v2005_v25 = vsel %vm1013_vm3, %v1989_v54, -inf  ;;  %v1992_v31 = vmul.f32 %v5223_v46, %v1984_v21 }
 0x50e   : > { %2006 = vmax.xlane.f32.xlu0 %v2005_v25 }
 0x50f   : > { %v1990_v27 = vmul.f32 %v5227_v51, %v1982_v17  ;;  %v2014_v36 = vsel %vm1013_vm3, %v1992_v31, -inf }
 0x511   : > { %v2008_v30 = vsel %vm1013_vm3, %v1990_v27, -inf }
 0x512   : > { %2012 = vmax.xlane.f32.xlu0 %v2011_v28  ;;  %2009 = vmax.xlane.f32.xlu1 %v2008_v30 }
 0x516   : > { %2015 = vmax.xlane.f32.xlu1 %v2014_v36 }
 0x58d   : > { %v2001_v38 = vpop.xlane.xlu0 %2000 }
 0x58e   : > { %v2019_v56 = vsub.f32 %v1987_v33, %v2001_v38 }
 0x590   : > { %v2029_v41 = vmul.f32 1.442695, %v2019_v56 }
 0x591   : > { %v1995_v42 = vpop.xlane.xlu0 %1994  ;;  %v2004_v43 = vpop.xlane.xlu1 %2003 }
 0x592   : > { %4841 = vpow2.f32 %v2029_v41  ;;  %v2017_v20 = vsub.f32 %v1985_v44, %v1995_v42  ;;  %v2020_v37 = vsub.f32 %v1988_v58, %v2004_v43 }
 0x594   : > { %v2025_v52 = vmul.f32 1.442695, %v2017_v20  ;;  %v2031_v62 = vmul.f32 1.442695, %v2020_v37 }
 0x595   : > { %v1998_v45 = vpop.xlane.xlu1 %1997 }
 0x596   : > { %4843 = vpow2.f32 %v2025_v52  ;;  %v2018_v47 = vsub.f32 %v1986_v6, %v1998_v45 }
 0x597   : > { %4845 = vpow2.f32 %v2031_v62  ;;  %v2007_v60 = vpop.xlane.xlu0 %2006 }
 0x598   : > { %v2027_v39 = vmul.f32 1.442695, %v2018_v47  ;;  %v2021_v18 = vsub.f32 %v1989_v54, %v2007_v60 }
 0x59a   : > { %4847 = vpow2.f32 %v2027_v39  ;;  %v2033_v19 = vmul.f32 1.442695, %v2021_v18 }
 0x59b   : > { %v2013_v1 = vpop.xlane.xlu0 %2012  ;;  %v2010_v10 = vpop.xlane.xlu1 %2009 }
 0x59c   : > { %4849 = vpow2.f32 %v2033_v19  ;;  %v2023_v33 = vsub.f32 %v1991_v26, %v2013_v1  ;;  %v2022_v22 = vsub.f32 %v1990_v27, %v2010_v10 }
 0x59e   : > { %v2037_v13 = vmul.f32 1.442695, %v2023_v33  ;;  %v2035_v24 = vmul.f32 1.442695, %v2022_v22 }
 0x59f   : > { %v4842_v44 = vpop.eup %4841  ;;  %v2016_v58 = vpop.xlane.xlu1 %2015 }
 0x5a0   : > { %4851 = vpow2.f32 %v2037_v13  ;;  %v2024_v35 = vsub.f32 %v1992_v31, %v2016_v58  ;;  %v2047_v21 = vsel %vm1013_vm3, %v4842_v44, 0.0 }
 0x5a1   : > { %4853 = vpow2.f32 %v2035_v24  ;;  %2048 = vadd.xlane.f32.xlu0 %v2047_v21 }
 0x5a2   : > { %v2039_v6 = vmul.f32 1.442695, %v2024_v35 }
 0x5a3   : > { %v4844_v17 = vpop.eup %4843 }
 0x5a4   : > { %v4846_v54 = vpop.eup %4845  ;;  %4855 = vpow2.f32 %v2039_v6  ;;  %v2041_v25 = vsel %vm1013_vm3, %v4844_v17, 0.0 }
 0x5a5   : > { %2042 = vadd.xlane.f32.xlu0 %v2041_v25  ;;  %v2050_v26 = vsel %vm1013_vm3, %v4846_v54, 0.0 }
 0x5a6   : > { %2051 = vadd.xlane.f32.xlu1 %v2050_v26 }
 0x5a7   : > { %v4848_v27 = vpop.eup %4847 }
 0x5a8   : > { %v2044_v28 = vsel %vm1013_vm3, %v4848_v27, 0.0 }
 0x5a9   : > { %v4850_v30 = vpop.eup %4849 }
 0x5aa   : > { %2045 = vadd.xlane.f32.xlu1 %v2044_v28  ;;  %v2053_v31 = vsel %vm1013_vm3, %v4850_v30, 0.0 }
 0x5ab   : > { %2054 = vadd.xlane.f32.xlu0 %v2053_v31 }
 0x5ad   : > { %v4852_v36 = vpop.eup %4851 }
 0x5ae   : > { %v4854_v38 = vpop.eup %4853  ;;  %v2059_v56 = vsel %vm1013_vm3, %v4852_v36, 0.0 }
 0x5af   : > { %2060 = vadd.xlane.f32.xlu0 %v2059_v56  ;;  %v2056_v41 = vsel %vm1013_vm3, %v4854_v38, 0.0 }
 0x5b0   : > { %2057 = vadd.xlane.f32.xlu1 %v2056_v41 }
 0x5b1   : > { %v4856_v42 = vpop.eup %4855 }
 0x5b2   : > { %v2062_v43 = vsel %vm1013_vm3, %v4856_v42, 0.0 }
 0x5b4   : > { %2063 = vadd.xlane.f32.xlu1 %v2062_v43 }
 0x62a   : > { %v2049_v20 = vpop.xlane.xlu0 %2048 }
 0x62b   : > { %4857 = vrcp.f32 %v2049_v20 }
 0x62e   : > { %v2043_v37 = vpop.xlane.xlu0 %2042 }
 0x62f   : > { %4859 = vrcp.f32 %v2043_v37  ;;  %v2052_v52 = vpop.xlane.xlu1 %2051 }
 0x630   : > { %4861 = vrcp.f32 %v2052_v52 }
 0x633   : > { %v2046_v62 = vpop.xlane.xlu1 %2045 }
 0x634   : > { %4863 = vrcp.f32 %v2046_v62  ;;  %v2055_v45 = vpop.xlane.xlu0 %2054 }
 0x635   : > { %4865 = vrcp.f32 %v2055_v45 }
 0x638   : > { %v2061_v47 = vpop.xlane.xlu0 %2060  ;;  %v4858_v60 = vpop.eup %4857 }
 0x639   : > { %4867 = vrcp.f32 %v2061_v47  ;;  %v2058_v39 = vpop.xlane.xlu1 %2057  ;;  %v2070_v19 = vmul.f32 %v4858_v60, %v4842_v44 }
 0x63a   : > { %4869 = vrcp.f32 %v2058_v39 }
 0x63b   : > { %v5401_v22 = vmul.f32 %v5191_v48, %v2070_v19 }
 0x63c   : > { %v4860_v18 = vpop.eup %4859 }
 0x63d   : > { %v4862_v1 = vpop.eup %4861  ;;  %v2064_v10 = vpop.xlane.xlu1 %2063  ;;  %v2066_v24 = vmul.f32 %v4860_v18, %v4844_v17 }
 0x63e   : > { %4871 = vrcp.f32 %v2064_v10  ;;  %v2072_v33 = vmul.f32 %v4862_v1, %v4846_v54 }
 0x63f   : > { %v5412_v44 = vmul.f32 %v5195_v53, %v2066_v24 }
 0x640   : > { %v5404_v13 = vmul.f32 %v5198_v55, %v2072_v33 }
 0x641   : > { %v4864_v58 = vpop.eup %4863 }
 0x642   : > { %v5408_v35 = vpack.c.bf16 %v5404_v13, %v5401_v22  ;;  %v2068_v21 = vmul.f32 %v4864_v58, %v4848_v27  ;;  %v4866_v6 = vpop.eup %4865 }
 0x643   : > { %v2074_v17 = vmul.f32 %v4866_v6, %v4850_v30 }
 0x644   : > { %2164 = vxpose.xlu1.c.b16.start.end [1/1] (short) (narrow) %v5408_v35, 16  ;;  %v5415_v54 = vmul.f32 %v5203_v3, %v2068_v21 }
 0x645   : > { %v5423_v27 = vmul.f32 %v5220_v40, %v2074_v17 }
 0x646   : > { %v4868_v48 = vpop.eup %4867  ;;  %v5419_v55 = vpack.c.bf16 %v5415_v54, %v5412_v44 }
 0x647   : > { %v4870_v25 = vpop.eup %4869  ;;  %v2078_v53 = vmul.f32 %v4868_v48, %v4852_v36 }
 0x648   : > { %2105 = vxpose.xlu0.c.b16.start.end [1/1] (short) (narrow) %v5419_v55, 16  ;;  %v2076_v26 = vmul.f32 %v4870_v25, %v4854_v38 }
 0x649   : > { %v5434_v30 = vmul.f32 %v5215_v29, %v2078_v53 }
 0x64a   : > { %v5426_v28 = vmul.f32 %v5227_v51, %v2076_v26 }
 0x64b   : > { %v4872_v31 = vpop.eup %4871 }
 0x64c   : > { %v5430_v3 = vpack.c.bf16 %v5426_v28, %v5423_v27  ;;  %v2080_v56 = vmul.f32 %v4872_v31, %v4856_v42 }
 0x64e   : > { %2223 = vxpose.xlu0.c.b16.start.end [1/1] (short) (narrow) %v5430_v3, 16  ;;  %v5437_v38 = vmul.f32 %v5223_v46, %v2080_v56 }
 0x650   : > { %v5441_v40 = vpack.c.bf16 %v5437_v38, %v5434_v30 }
 0x652   : > { %2282 = vxpose.xlu1.c.b16.start.end [1/1] (short) (narrow) %v5441_v40, 16 }
 0x6a6   : > { %v5444_v51 = vpop.trf.xlu1 }
 0x6a7   : > { %4583 = vmatmul.mubr.msk.bf16.vlgmr.msra.gmra.mxu1 %vm738_vm1, %v5444_v51 }
 0x6a8   : > { %4593 = vmatpush3.bf16.msra.mxu1 %v2104_v61  ;;  %4594 = vmatprep.mubr.msk.bf16.mxu1 %vm4921_vm0, %v4920_v0  ;;  %v4922_v61 = vmov 1983009808  }
 0x6a9   : > { %4604 = vmatprep.subr.bf16.mxu1 %v4920_v0 }
 0x6aa   : > { %v5454_v29 = vpop.trf.xlu0 }
 0x6ab   : > { %4577 = vmatmul.mubr.msk.bf16.vlgmr.msra.gmra.mxu0 %vm738_vm1, %v5454_v29 }
 0x6ac   : > { %4587 = vmatpush3.bf16.msra.mxu0 %v2103_v63  ;;  %4588 = vmatprep.mubr.msk.bf16.mxu0 %vm4921_vm0, %v4920_v0 }
 0x6ad   : > { %4598 = vmatprep.subr.bf16.mxu0 %v4920_v0 }
 0x6b0   : > { %v5464_v46 = vpop.trf.xlu0 }
 0x6b3   : > { %4589 = vmatmul.mubr.msk.bf16.vlgmr.msra.gmra.mxu0 %vm738_vm1, %v5464_v46 }
 0x6b4   : > { %4599 = vmatpush3.bf16.msra.mxu0 %v5419_v55  ;;  %v5469_v49 = vpop.trf.xlu1  ;;  %4600 = vmatprep.mubr.msk.bf16.mxu0 %vm4921_vm0, %v4920_v0 }
 0x6b5   : > { %4595 = vmatmul.mubr.msk.bf16.vlgmr.msra.gmra.mxu1 %vm738_vm1, %v5469_v49  ;;  %4610 = vmatprep.subr.bf16.mxu0 %v4920_v0 }
 0x6b6   : > { %4605 = vmatpush3.bf16.msra.mxu1 %v5408_v35  ;;  %4606 = vmatprep.mubr.msk.bf16.mxu1 %vm4921_vm0, %v4920_v0 }
 0x6b7   : > { %4616 = vmatprep.subr.bf16.mxu1 %v4920_v0 }
 0x6bb   : > { %4601 = vmatmul.mubr.msk.bf16.vlgmr.msra.gmra.mxu0 %vm738_vm1, %v5063_v2 }
 0x6bc   : > { %4611 = vmatpush3.bf16.msra.mxu0 %v5430_v3  ;;  %4612 = vmatprep.mubr.msk.bf16.mxu0 %vm4921_vm0, %v4920_v0 }
 0x6bd   : > { %4607 = vmatmul.mubr.msk.bf16.vlgmr.msra.gmra.mxu1 %vm738_vm1, %v5065_v4  ;;  %4622 = vmatprep.subr.bf16.mxu0 %v4920_v0 }
 0x6be   : > { %4617 = vmatpush3.bf16.msra.mxu1 %v5441_v40  ;;  %4618 = vmatprep.mubr.msk.bf16.mxu1 %vm4921_vm0, %v4920_v0 }
 0x6bf   : > { %4628 = vmatprep.subr.bf16.mxu1 %v4920_v0 }
 0x6c3   : > { %4613 = vmatmul.mubr.msk.bf16.vlgmr.msra.gmra.mxu0 %vm738_vm1, %v5077_v9  ;;  %v3338_v9 = vunpack.c.l.s4 %v4922_v61 }
 0x6c4   : > { %4624 = vmatprep.mubr.msk.bf16.mxu0 %vm4921_vm0, %v4920_v0 }
 0x6c5   : > { %4619 = vmatmul.mubr.msk.bf16.vlgmr.msra.gmra.mxu1 %vm738_vm1, %v5086_v12  ;;  %v3339_v42 = vunpack.c.0.s8 %v3338_v9 }
 0x6c6   : > { %4630 = vmatprep.mubr.msk.bf16.mxu1 %vm4921_vm0, %v4920_v0 }
 0x6c7   : > { %v5509_v20 = vsub.s32 %v3339_v42, %v5178_v34 }
 0x767   : > { %v5500_v2 = vpop.f32.mrf.mxu1 }
 0x769   : > { %v4584_v4 = vpop.f32.mrf.mxu1 }
 0x76b   : > { %v5502_v50 = vpop.f32.mrf.mxu0  ;;  %v2220_v57 = vpop.f32.mrf.mxu1 }
 0x76c   : > { %v4267_v59 = vpack.c.bf16 %v5500_v2, %v5502_v50 }
 0x76d   : > { %v4578_v63 = vpop.f32.mrf.mxu0  ;;  %v4585_v36 = vpop.f32.mrf.mxu1 }
 0x76e   : > { %v5516_v60 = vrot.slane %v4267_v59, %v5509_v20 }
 0x76f   : > { %v2161_v41 = vpop.f32.mrf.mxu0 }
 0x771   : > { %v4579_v43 = vpop.f32.mrf.mxu0 }
 0x773   : > { %v5506_v12 = vpop.f32.mrf.mxu0 }
 0x775   : > { %v4590_v37 = vpop.f32.mrf.mxu0  ;;  %v5511_v52 = vpop.f32.mrf.mxu1 }
 0x776   : > { %v4268_v62 = vpack.c.bf16 %v5511_v52, %v5506_v12 }
 0x777   : > { %v2279_v45 = vpop.f32.mrf.mxu0  ;;  %v4596_v47 = vpop.f32.mrf.mxu1 }
 0x778   : > { %v5519_v39 = vrot.slane %v4268_v62, %v5509_v20 }
 0x779   : > { %v4591_v18 = vpop.f32.mrf.mxu0  ;;  %v2338_v19 = vpop.f32.mrf.mxu1 }
 0x77a   : > { %v3351_v34 = vcombine.low %v5516_v60, %v5519_v39  ;;  %v2832_v60 = vmul.f32 %v5082_v11, %v5082_v11  ;;  %v3022_v39 = vadd.f32 1e-15, %v5404_v13 }
 0x77b   : > { %v4597_v1 = vpop.f32.mrf.mxu1  ;;  %v5523_v10 = vpop.f32.mrf.mxu0 }
 0x77c   : > { %v4805_v1 = vld [vmem:[%s5933_s13 + $0x8] sm:$0xff]   ;;  %v2846_v11 = vsel %vm738_vm1, %v2832_v60, 0.0 }
 0x77d   : > { %v4602_v33 = vpop.f32.mrf.mxu0  ;;  %v5525_v24 = vpop.f32.mrf.mxu1 }
 0x77e   : > { %v2889_v33 = vmul.f32 %v5523_v10, %v5412_v44 }
 0x77f   : > { %v5527_v58 = vpop.f32.mrf.mxu0  ;;  %v4608_v21 = vpop.f32.mrf.mxu1 }
 0x780   : > { %v2505_v6 = vpack.c.bf16 %v5527_v58, %v5523_v10 }
 0x781   : > { %v4603_v48 = vpop.f32.mrf.mxu0  ;;  %v5531_v17 = vpop.f32.mrf.mxu1 }
 0x782   : > { %v2506_v25 = vpack.c.bf16 %v5531_v17, %v5525_v24  ;;  %4623 = vmatpush3.bf16.msra.mxu0 %v2505_v6 }
 0x783   : > { %v4609_v26 = vpop.f32.mrf.mxu1  ;;  %v5535_v53 = vpop.f32.mrf.mxu0  ;;  %4634 = vmatprep.subr.bf16.mxu0 %v4920_v0 }
 0x784   : > { %4629 = vmatpush3.bf16.msra.mxu1 %v2506_v25  ;;  %v2890_v26 = vmul.f32 %v5527_v58, %v5415_v54  ;;  %v2897_v58 = vsel %vm1013_vm3, %v2889_v33, 0.0 }
 0x785   : > { %v4614_v31 = vpop.f32.mrf.mxu0  ;;  %v5538_v56 = vpop.f32.mrf.mxu1  ;;  %4625 = vmatmul.mubr.msk.bf16.vlgmr.msra.gmra.mxu0 %vm738_vm1, %v5454_v29  ;;  %4640 = vmatprep.subr.bf16.mxu1 %v4920_v0 }
 0x786   : > { %4636 = vmatprep.mubr.msk.bf16.mxu0 %vm4921_vm0, %v4920_v0 }
 0x787   : > { %v5545_v4 = vpop.f32.mrf.mxu0  ;;  %v4620_v57 = vpop.f32.mrf.mxu1  ;;  %4631 = vmatmul.mubr.msk.bf16.vlgmr.msra.gmra.mxu1 %vm738_vm1, %v5444_v51 }
 0x788   : > { %v2507_v59 = vpack.c.bf16 %v5545_v4, %v5535_v53  ;;  %4642 = vmatprep.mubr.msk.bf16.mxu1 %vm4921_vm0, %v4920_v0 }
 0x789   : > { %v5553_v61 = vpop.f32.mrf.mxu1  ;;  %v4615_v9 = vpop.f32.mrf.mxu0 }
 0x78a   : > { %v2508_v63 = vpack.c.bf16 %v5553_v61, %v5538_v56  ;;  %4635 = vmatpush3.bf16.msra.mxu0 %v2507_v59  ;;  %v4806_v9 = vld [vmem:[%s5933_s13] sm:$0xff]  }
 0x78b   : > { %v4621_v36 = vpop.f32.mrf.mxu1  ;;  %4646 = vmatprep.subr.bf16.mxu0 %v4920_v0 }
 0x78c   : > { %4641 = vmatpush3.bf16.msra.mxu1 %v2508_v63  ;;  %v2891_v63 = vmul.f32 %v5525_v24, %v5401_v22  ;;  %v2829_v24 = vmul.f32 %v5068_v5, %v5068_v5 }
 0x78d   : > { %4637 = vmatmul.mubr.msk.bf16.vlgmr.msra.gmra.mxu0 %vm738_vm1, %v5464_v46  ;;  %4652 = vmatprep.subr.bf16.mxu1 %v4920_v0 }
 0x78e   : > { %4647 = vmatpush3.bf16.msra.mxu0 %v5419_v55  ;;  %4648 = vmatprep.mubr.msk.bf16.mxu0 %vm4921_vm0, %v4920_v0  ;;  %v3128_v55 = vpack.c.bf16 %v5500_v2, %v5500_v2 }
 0x78f   : > { %4643 = vmatmul.mubr.msk.bf16.vlgmr.msra.gmra.mxu1 %vm738_vm1, %v5469_v49  ;;  %4658 = vmatprep.subr.bf16.mxu0 %v4920_v0 }
 0x790   : > { %4653 = vmatpush3.bf16.msra.mxu1 %v5408_v35  ;;  %4654 = vmatprep.mubr.msk.bf16.mxu1 %vm4921_vm0, %v4920_v0  ;;  %v3127_v35 = vpack.c.bf16 %v5502_v50, %v5502_v50 }
 0x791   : > { %4664 = vmatprep.subr.bf16.mxu1 %v4920_v0 }
 0x795   : > { %4649 = vmatmul.mubr.msk.bf16.vlgmr.msra.gmra.mxu0 %vm738_vm1, %v5454_v29 }
 0x796   : > { %4659 = vmatpush3.bf16.msra.mxu0 %v5430_v3  ;;  %4660 = vmatprep.mubr.msk.bf16.mxu0 %vm4921_vm0, %v4920_v0  ;;  %v3135_v3 = vsel %vm1026_vm2, %v3127_v35, 0 }
 0x797   : > { %4655 = vmatmul.mubr.msk.bf16.vlgmr.msra.gmra.mxu1 %vm738_vm1, %v5444_v51  ;;  %4670 = vmatprep.subr.bf16.mxu0 %v4920_v0  ;;  %v3129_v51 = vpack.c.bf16 %v5506_v12, %v5506_v12 }
 0x798   : > { %4665 = vmatpush3.bf16.msra.mxu1 %v5441_v40  ;;  %4666 = vmatprep.mubr.msk.bf16.mxu1 %vm4921_vm0, %v4920_v0  ;;  %v3181_v40 = vsel %vm1026_vm2, %v3128_v55, 0  ;;  %v2892_v55 = vmul.f32 %v5531_v17, %v5404_v13  ;;  %v3020_v17 = vadd.f32 1e-15, %v5415_v54 }
 0x799   : > { %4676 = vmatprep.subr.bf16.mxu1 %v4920_v0  ;;  %v3227_v43 = vsel %vm1026_vm2, %v3129_v51, 0 }
 0x79a   : > { %4873 = vlog2.f32 %v3020_v17 }
 0x79d   : > { %4661 = vmatmul.mubr.msk.bf16.vlgmr.msra.gmra.mxu0 %vm738_vm1, %v5464_v46  ;;  %v3130_v46 = vpack.c.bf16 %v5511_v52, %v5511_v52 }
 0x79e   : > { %4671 = vmatpush3.bf16.msra.mxu0 %v3135_v3  ;;  %4672 = vmatprep.mubr.msk.bf16.mxu0 %vm4921_vm0, %v4920_v0  ;;  %v2900_v3 = vsel %vm1013_vm3, %v2890_v26, 0.0 }
 0x79f   : > { %4667 = vmatmul.mubr.msk.bf16.vlgmr.msra.gmra.mxu1 %vm738_vm1, %v5469_v49  ;;  %4682 = vmatprep.subr.bf16.mxu0 %v4920_v0  ;;  %v3273_v62 = vsel %vm1026_vm2, %v3130_v46, 0  ;;  %v2830_v46 = vmul.f32 %v5072_v7, %v5072_v7  ;;  %v2831_v7 = vmul.f32 %v5075_v8, %v5075_v8 }
 0x7a0   : > { %4677 = vmatpush3.bf16.msra.mxu1 %v3181_v40  ;;  %4678 = vmatprep.mubr.msk.bf16.mxu1 %vm4921_vm0, %v4920_v0 }
 0x7a1   : > { %4688 = vmatprep.subr.bf16.mxu1 %v4920_v0  ;;  %v2843_v8 = vsel %vm738_vm1, %v2831_v7, 0.0 }
 0x845   : > { %v2543_v29 = vpop.f32.mrf.mxu0 }
 0x846   : > { %v5603_v2 = vpack.c.bf16 %v2543_v29, %v2543_v29  ;;  %v3103_v49 = vsel %vm2953_vm13, %v2543_v29, 0.0  ;;  %v2903_v29 = vsel %vm1013_vm3, %v2891_v63, 0.0 }
 0x847   : > { %3104 = vadd.xlane.f32.xlu0 %v3103_v49  ;;  %v4626_v50 = vpop.f32.mrf.mxu0  ;;  %v2583_v41 = vpop.f32.mrf.mxu1 }
 0x848   : > { %v5606_v42 = vpack.c.bf16 %v2583_v41, %v2583_v41  ;;  %4673 = vmatmul.mubr.msk.bf16.vlgmr.msra.gmra.mxu0 %vm1013_vm3, %v5603_v2  ;;  %v3106_v12 = vsel %vm2953_vm13, %v2583_v41, 0.0  ;;  %v2906_v50 = vsel %vm1013_vm3, %v2892_v55, 0.0  ;;  %v2837_v41 = vsel %vm738_vm1, %v2829_v24, 0.0 }
 0x849   : > { %4683 = vmatpush3.bf16.msra.mxu0 %v3227_v43  ;;  %v2546_v37 = vpop.f32.mrf.mxu0  ;;  %3107 = vadd.xlane.f32.xlu1 %v3106_v12  ;;  %v4632_v52 = vpop.f32.mrf.mxu1  ;;  %v3019_v43 = vadd.f32 1e-15, %v5412_v44  ;;  %v2896_v55 = vmul.f32 %v5553_v61, %v5437_v38 }
 0x84a   : > { %4679 = vmatmul.mubr.msk.bf16.vlgmr.msra.gmra.mxu1 %vm1013_vm3, %v5606_v42  ;;  %4684 = vmatprep.mubr.msk.bf16.mxu0 %vm4921_vm0, %v4920_v0  ;;  %v2840_v52 = vsel %vm738_vm1, %v2830_v46, 0.0  ;;  %v3025_v46 = vadd.f32 1e-15, %v5434_v30 }
 0x84b   : > { %4689 = vmatpush3.bf16.msra.mxu1 %v3273_v62  ;;  %v4627_v45 = vpop.f32.mrf.mxu0  ;;  %v2586_v47 = vpop.f32.mrf.mxu1  ;;  %4694 = vmatprep.subr.bf16.mxu0 %v4920_v0  ;;  %4875 = vlog2.f32 %v3019_v43  ;;  %v2918_v61 = vsel %vm1013_vm3, %v2896_v55, 0.0  ;;  %v3011_v43 = vsub.f32 0.0, %v5412_v44 }
 0x84c   : > { %4690 = vmatprep.mubr.msk.bf16.mxu1 %vm4921_vm0, %v4920_v0  ;;  %4702 = vmatprep.subr.bf16.mxu1 %v4920_v0  ;;  %v3021_v45 = vadd.f32 1e-15, %v5401_v22  ;;  %4877 = vlog2.f32 %v3022_v39 }
 0x84d   : > { %v4633_v18 = vpop.f32.mrf.mxu1  ;;  %v2623_v19 = vpop.f32.mrf.mxu0 }
 0x84e   : > { %v5626_v21 = vpack.c.bf16 %v2623_v19, %v2623_v19  ;;  %v3109_v6 = vsel %vm2953_vm13, %v2623_v19, 0.0  ;;  %v2893_v19 = vmul.f32 %v5535_v53, %v5423_v27  ;;  %4879 = vlog2.f32 %v3021_v45 }
 0x84f   : > { %3110 = vadd.xlane.f32.xlu0 %v3109_v6  ;;  %v4638_v48 = vpop.f32.mrf.mxu0  ;;  %v2663_v25 = vpop.f32.mrf.mxu1  ;;  %v2894_v6 = vmul.f32 %v5545_v4, %v5426_v28  ;;  %v2834_v53 = vmul.f32 %v5091_v14, %v5091_v14  ;;  %v3024_v14 = vadd.f32 1e-15, %v5426_v28 }
 0x850   : > { %v5631_v31 = vpack.c.bf16 %v2663_v25, %v2663_v25  ;;  %4685 = vmatmul.mubr.msk.bf16.vlgmr.msra.gmra.mxu0 %vm1013_vm3, %v5626_v21  ;;  %v3112_v57 = vsel %vm2953_vm13, %v2663_v25, 0.0  ;;  %v2833_v48 = vmul.f32 %v5096_v15, %v5096_v15  ;;  %v3023_v15 = vadd.f32 1e-15, %v5423_v27 }
 0x851   : > { %v2626_v59 = vpop.f32.mrf.mxu0  ;;  %4695 = vmatpush3.bf16.msra.mxu0 %v4805_v1  ;;  %3113 = vadd.xlane.f32.xlu1 %v3112_v57  ;;  %v4644_v10 = vpop.f32.mrf.mxu1  ;;  %v2909_v57 = vsel %vm1013_vm3, %v2893_v19, 0.0 }
 0x852   : > { %4691 = vmatmul.mubr.msk.bf16.vlgmr.msra.gmra.mxu1 %vm1013_vm3, %v5631_v31  ;;  %4696 = vmatprep.subr.bf16.mxu0 %v4920_v0  ;;  %v2849_v63 = vsel %vm738_vm1, %v2833_v48, 0.0  ;;  %4881 = vlog2.f32 %v3023_v15  ;;  %v3017_v15 = vsub.f32 0.0, %v5434_v30 }
 0x853   : > { %2898 = vadd.xlane.f32.xlu0 %v2897_v58  ;;  %v4639_v36 = vpop.f32.mrf.mxu0  ;;  %v2666_v35 = vpop.f32.mrf.mxu1  ;;  %4698 = vmatprep.mubr.msk.bf16.mxu0 %vm4921_vm0, %v4920_v0  ;;  %v2895_v58 = vmul.f32 %v5538_v56, %v5434_v30  ;;  %v2836_v56 = vmul.f32 %v5117_v23, %v5117_v23  ;;  %4883 = vlog2.f32 %v3024_v14  ;;  %v4807_v30 = vld [vmem:[%s5932_s12 + $0x8] sm:$0xff]  }
 0x854   : > { %4706 = vmatprep.mubr.msk.bf16.mxu1 %vm4921_vm0, %v4920_v0  ;;  %v2852_v36 = vsel %vm738_vm1, %v2834_v53, 0.0  ;;  %v4874_v35 = vpop.eup %4873  ;;  %4885 = vlog2.f32 %v3025_v46  ;;  %4703 = vmatpush3.bf16.msra.mxu1 %v4807_v30 }
 0x855   : > { %v5654_v40 = vpop.f32.mrf.mxu0  ;;  %4697 = vmatpush3.bf16.msra.mxu0 %v4806_v9  ;;  %2901 = vadd.xlane.f32.xlu1 %v2900_v3  ;;  %v4645_v51 = vpop.f32.mrf.mxu1  ;;  %v2912_v9 = vsel %vm1013_vm3, %v2894_v6, 0.0  ;;  %v2835_v3 = vmul.f32 %v5099_v16, %v5099_v16  ;;  %v2858_v23 = vsel %vm738_vm1, %v2836_v56, 0.0 }
 0x856   : > { %4710 = vmatprep.subr.bf16.mxu0 %v4920_v0  ;;  %v2915_v51 = vsel %vm1013_vm3, %v2895_v58, 0.0  ;;  %4704 = vmatprep.subr.bf16.mxu1 %v4920_v0 }
 0x857   : > { %v4650_v49 = vpop.f32.mrf.mxu0  ;;  %2904 = vadd.xlane.f32.xlu0 %v2903_v29  ;;  %v5661_v5 = vpop.f32.mrf.mxu1  ;;  %v3030_v29 = vmul.f32 0.6931472, %v4874_v35  ;;  %v2855_v16 = vsel %vm738_vm1, %v2835_v3, 0.0 }
 0x858   : > { %4699 = vmatmul.mubr.msk.bf16.vlgmr.msra.gmra.mxu0 %vm1406_vm12, %v3351_v34  ;;  %v4876_v24 = vpop.eup %4875  ;;  %v3012_v49 = vsub.f32 0.0, %v5415_v54  ;;  %v3014_v54 = vsub.f32 0.0, %v5404_v13 }
 0x859   : > { %v2706_v12 = vpop.f32.mrf.mxu0  ;;  %2907 = vadd.xlane.f32.xlu1 %v2906_v50  ;;  %v4656_v37 = vpop.f32.mrf.mxu1  ;;  %4712 = vmatprep.mubr.msk.bf16.mxu0 %vm4921_vm0, %v4920_v0  ;;  %v3028_v50 = vmul.f32 0.6931472, %v4876_v24 }
 0x85a   : > { %v4878_v17 = vpop.eup %4877  ;;  %v3044_v12 = vmul.f32 %v3030_v29, %v3012_v49 }
 0x85b   : > { %v4651_v34 = vpop.f32.mrf.mxu0  ;;  %2838 = vadd.xlane.f32.xlu0 %v2837_v41  ;;  %v2746_v62 = vpop.f32.mrf.mxu1  ;;  %v3026_v41 = vadd.f32 1e-15, %v5437_v38  ;;  %v3034_v37 = vmul.f32 0.6931472, %v4878_v17 }
 0x85c   : > { %v4880_v7 = vpop.eup %4879  ;;  %v3054_v39 = vsel %vm1013_vm3, %v3044_v12, 0.0  ;;  %v3013_v62 = vsub.f32 0.0, %v5401_v22 }
 0x85d   : > { %v5680_v47 = vpop.f32.mrf.mxu0  ;;  %2841 = vadd.xlane.f32.xlu1 %v2840_v52  ;;  %v4657_v18 = vpop.f32.mrf.mxu1  ;;  %v3043_v52 = vmul.f32 %v3028_v50, %v3011_v43  ;;  %v3032_v60 = vmul.f32 0.6931472, %v4880_v7  ;;  %4887 = vlog2.f32 %v3026_v41  ;;  %v3046_v34 = vmul.f32 %v3034_v37, %v3014_v54 }
 0x85e   : > { %v2949_v18 = vmul.f32 %v5654_v40, %v5654_v40  ;;  %v2951_v22 = vmul.f32 %v5680_v47, %v5680_v47  ;;  %v3016_v47 = vsub.f32 0.0, %v5426_v28 }
 0x85f   : > { %v4662_v1 = vpop.f32.mrf.mxu0  ;;  %2844 = vadd.xlane.f32.xlu0 %v2843_v8  ;;  %v5685_v33 = vpop.f32.mrf.mxu1  ;;  %v3051_v44 = vsel %vm1013_vm3, %v3043_v52, 0.0  ;;  %v3045_v8 = vmul.f32 %v3032_v60, %v3013_v62  ;;  %v3060_v19 = vsel %vm1013_vm3, %v3046_v34, 0.0 }
 0x860   : > { %v4882_v45 = vpop.eup %4881  ;;  %v2954_v6 = vsel %vm2953_vm13, %v2949_v18, 0.0  ;;  %v2952_v40 = vmul.f32 %v5685_v33, %v5685_v33 }
 0x861   : > { %v2786_v25 = vpop.f32.mrf.mxu0  ;;  %2847 = vadd.xlane.f32.xlu1 %v2846_v11  ;;  %v4668_v26 = vpop.f32.mrf.mxu1  ;;  %v2950_v11 = vmul.f32 %v5661_v5, %v5661_v5  ;;  %v3057_v1 = vsel %vm1013_vm3, %v3045_v8, 0.0  ;;  %v3036_v48 = vmul.f32 0.6931472, %v4882_v45 }
 0x862   : > { %v4884_v13 = vpop.eup %4883 }
 0x863   : > { %v4663_v59 = vpop.f32.mrf.mxu0  ;;  %2910 = vadd.xlane.f32.xlu0 %v2909_v57  ;;  %v2826_v10 = vpop.f32.mrf.mxu1  ;;  %v2957_v26 = vsel %vm2953_vm13, %v2950_v11, 0.0  ;;  %v3015_v57 = vsub.f32 0.0, %v5423_v27  ;;  %v3038_v53 = vmul.f32 0.6931472, %v4884_v13 }
 0x864   : > { %v4886_v25 = vpop.eup %4885  ;;  %v2960_v59 = vsel %vm2953_vm13, %v2951_v22, 0.0 }
 0x865   : > { %2913 = vadd.xlane.f32.xlu1 %v2912_v9  ;;  %v4669_v4 = vpop.f32.mrf.mxu1  ;;  %v3047_v10 = vmul.f32 %v3036_v48, %v3015_v57  ;;  %v3040_v9 = vmul.f32 0.6931472, %v4886_v25 }
 0x866   : > { %v3048_v4 = vmul.f32 %v3038_v53, %v3016_v47 }
 0x867   : > { %2850 = vadd.xlane.f32.xlu0 %v2849_v63  ;;  %v2963_v63 = vsel %vm2953_vm13, %v2952_v40, 0.0  ;;  %v3063_v58 = vsel %vm1013_vm3, %v3047_v10, 0.0  ;;  %v3049_v27 = vmul.f32 %v3040_v9, %v3017_v15 }
 0x868   : > { %v3066_v35 = vsel %vm1013_vm3, %v3048_v4, 0.0 }
 0x869   : > { %2853 = vadd.xlane.f32.xlu1 %v2852_v36  ;;  %v3018_v36 = vsub.f32 0.0, %v5437_v38  ;;  %v3069_v28 = vsel %vm1013_vm3, %v3049_v27, 0.0  ;;  %v4808_v38 = vld [vmem:[%s5932_s12] sm:$0xff]  }
 0x86a   : > { %v4888_v5 = vpop.eup %4887  ;;  %4705 = vmatpush3.bf16.msra.mxu1 %v4808_v38 }
 0x86b   : > { %2916 = vadd.xlane.f32.xlu0 %v2915_v51  ;;  %v3042_v33 = vmul.f32 0.6931472, %v4888_v5  ;;  %4716 = vmatprep.subr.bf16.mxu1 %v4920_v0 }
 0x86d   : > { %2919 = vadd.xlane.f32.xlu1 %v2918_v61  ;;  %v3050_v14 = vmul.f32 %v3042_v33, %v3018_v36 }
 0x86f   : > { %2856 = vadd.xlane.f32.xlu0 %v2855_v16  ;;  %v3072_v55 = vsel %vm1013_vm3, %v3050_v14, 0.0 }
 0x871   : > { %2859 = vadd.xlane.f32.xlu1 %v2858_v23 }
 0x873   : > { %3055 = vadd.xlane.f32.xlu0 %v3054_v39 }
 0x875   : > { %3052 = vadd.xlane.f32.xlu1 %v3051_v44 }
 0x877   : > { %3061 = vadd.xlane.f32.xlu0 %v3060_v19 }
 0x879   : > { %3058 = vadd.xlane.f32.xlu1 %v3057_v1 }
 0x87b   : > { %2955 = vadd.xlane.f32.xlu0 %v2954_v6 }
 0x87d   : > { %2958 = vadd.xlane.f32.xlu1 %v2957_v26 }
 0x87f   : > { %2961 = vadd.xlane.f32.xlu0 %v2960_v59 }
 0x881   : > { %2964 = vadd.xlane.f32.xlu1 %v2963_v63 }
 0x883   : > { %3064 = vadd.xlane.f32.xlu0 %v3063_v58 }
 0x885   : > { %3067 = vadd.xlane.f32.xlu1 %v3066_v35 }
 0x887   : > { %3070 = vadd.xlane.f32.xlu0 %v3069_v28 }
 0x889   : > { %3073 = vadd.xlane.f32.xlu1 %v3072_v55 }
 0x8d0   : > { %v5749_v3 = vpop.xlane.xlu0 %3104 }
 0x8d1   : > { %v3115_v14 = vmax.f32 %v5749_v3, 1.0 }
 0x8d2   : > { %v3108_v24 = vpop.xlane.xlu1 %3107 }
 0x8d3   : > { %v3116_v15 = vmax.f32 %v3108_v24, 1.0 }
 0x8d5   : > { %4889 = vrcp.f32 %v3116_v15 }
 0x8d6   : > { %4891 = vrcp.f32 %v3115_v14 }
 0x8d8   : > { %v5751_v51 = vpop.xlane.xlu0 %3110 }
 0x8d9   : > { %v3117_v24 = vmax.f32 %v5751_v51, 1.0 }
 0x8da   : > { %v5753_v56 = vpop.xlane.xlu1 %3113 }
 0x8db   : > { %4893 = vrcp.f32 %v3117_v24 }
 0x8dc   : > { %v2899_v29 = vpop.xlane.xlu0 %2898 }
 0x8de   : > { %v2902_v46 = vpop.xlane.xlu1 %2901 }
 0x8df   : > { %v2921_v7 = vadd.f32 %v2902_v46, %v2899_v29 }
 0x8e0   : > { %v2905_v17 = vpop.xlane.xlu0 %2904 }
 0x8e1   : > { %v2922_v54 = vrot.slane %v2921_v7, 4 }
 0x8e2   : > { %v2908_v49 = vpop.xlane.xlu1 %2907 }
 0x8e3   : > { %v2928_v23 = vadd.f32 %v2908_v49, %v2905_v17  ;;  %v2923_v18 = vadd.f32 %v2922_v54, %v2921_v7 }
 0x8e4   : > { %v2839_v61 = vpop.xlane.xlu0 %2838 }
 0x8e5   : > { %v2929_v34 = vrot.slane %v2928_v23, 4  ;;  %v2924_v40 = vrot.slane %v2923_v18, 2 }
 0x8e6   : > { %v2842_v16 = vpop.xlane.xlu1 %2841 }
 0x8e7   : > { %v2861_v12 = vadd.f32 %v2842_v16, %v2839_v61  ;;  %v2930_v11 = vadd.f32 %v2929_v34, %v2928_v23  ;;  %v2925_v33 = vadd.f32 %v2924_v40, %v2923_v18 }
 0x8e8   : > { %v2845_v50 = vpop.xlane.xlu0 %2844 }
 0x8e9   : > { %v2862_v62 = vrot.slane %v2861_v12, 4  ;;  %v2931_v53 = vrot.slane %v2930_v11, 2  ;;  %v2926_v49 = vrot.slane %v2925_v33, 1 }
 0x8ea   : > { %v2848_v41 = vpop.xlane.xlu1 %2847 }
 0x8eb   : > { %v2868_v52 = vadd.f32 %v2848_v41, %v2845_v50  ;;  %v2863_v1 = vadd.f32 %v2862_v62, %v2861_v12  ;;  %v2932_v36 = vadd.f32 %v2931_v53, %v2930_v11 }
 0x8ec   : > { %v2911_v43 = vpop.xlane.xlu0 %2910 }
 0x8ed   : > { %v2869_v8 = vrot.slane %v2868_v52, 4  ;;  %v2864_v59 = vrot.slane %v2863_v1, 2  ;;  %v2933_v50 = vrot.slane %v2932_v36, 1 }
 0x8ee   : > { %v2914_v37 = vpop.xlane.xlu1 %2913 }
 0x8ef   : > { %v2935_v60 = vadd.f32 %v2914_v37, %v2911_v43  ;;  %v2870_v48 = vadd.f32 %v2869_v8, %v2868_v52  ;;  %v2865_v28 = vadd.f32 %v2864_v59, %v2863_v1  ;;  %v3118_v43 = vmax.f32 %v5753_v56, 1.0 }
 0x8f0   : > { %v2851_v39 = vpop.xlane.xlu0 %2850 }
 0x8f1   : > { %v2936_v19 = vrot.slane %v2935_v60, 4  ;;  %v2871_v9 = vrot.slane %v2870_v48, 2  ;;  %v2866_v3 = vrot.slane %v2865_v28, 1  ;;  %4895 = vrcp.f32 %v3118_v43 }
 0x8f2   : > { %v2854_v44 = vpop.xlane.xlu1 %2853 }
 0x8f3   : > { %v2875_v45 = vadd.f32 %v2854_v44, %v2851_v39  ;;  %v2937_v26 = vadd.f32 %v2936_v19, %v2935_v60  ;;  %v2872_v38 = vadd.f32 %v2871_v9, %v2870_v48  ;;  %v2927_v60 = vadd.f32 %v2926_v49, %v2925_v33 }
 0x8f4   : > { %v2917_v13 = vpop.xlane.xlu0 %2916  ;;  %v2934_v44 = vadd.f32 %v2933_v50, %v2932_v36 }
 0x8f5   : > { %v2876_v22 = vrot.slane %v2875_v45, 4  ;;  %v2938_v58 = vrot.slane %v2937_v26, 2  ;;  %v2873_v37 = vrot.slane %v2872_v38, 1 }
 0x8f6   : > { %v2920_v6 = vpop.xlane.xlu1 %2919  ;;  %v5766_v53 = vmul.f32 2.0, %v2934_v44 }
 0x8f7   : > { %v2942_v25 = vadd.f32 %v2920_v6, %v2917_v13  ;;  %v2877_v10 = vadd.f32 %v2876_v22, %v2875_v45  ;;  %v2939_v61 = vadd.f32 %v2938_v58, %v2937_v26  ;;  %v5758_v45 = vadd.f32 %v2866_v3, %v2865_v28 }
 0x8f8   : > { %v2857_v57 = vpop.xlane.xlu0 %2856  ;;  %v5761_v13 = vadd.f32 %v2873_v37, %v2872_v38  ;;  %v5763_v6 = vmul.f32 2.0, %v2927_v60 }
 0x8f9   : > { %v2943_v5 = vrot.slane %v2942_v25, 4  ;;  %v2878_v55 = vrot.slane %v2877_v10, 2  ;;  %v2940_v39 = vrot.slane %v2939_v61, 1 }
 0x8fa   : > { %v2860_v47 = vpop.xlane.xlu1 %2859  ;;  %v3000_v58 = vsub.f32 %v5761_v13, %v5766_v53 }
 0x8fb   : > { %v2944_v63 = vadd.f32 %v2943_v5, %v2942_v25  ;;  %v2882_v4 = vadd.f32 %v2860_v47, %v2857_v57  ;;  %v2879_v23 = vadd.f32 %v2878_v55, %v2877_v10  ;;  %v2941_v48 = vadd.f32 %v2940_v39, %v2939_v61 }
 0x8fc   : > { %v3056_v27 = vpop.xlane.xlu0 %3055  ;;  %v2999_v47 = vsub.f32 %v5758_v45, %v5763_v6 }
 0x8fd   : > { %v2883_v35 = vrot.slane %v2882_v4, 4  ;;  %v2945_v29 = vrot.slane %v2944_v63, 2  ;;  %v2880_v18 = vrot.slane %v2879_v23, 1  ;;  %v5775_v28 = vmul.f32 2.0, %v2941_v48 }
 0x8fe   : > { %v3053_v30 = vpop.xlane.xlu1 %3052 }
 0x8ff   : > { %v2884_v46 = vadd.f32 %v2883_v35, %v2882_v4  ;;  %v3075_v17 = vadd.f32 %v3056_v27, %v3053_v30  ;;  %v2946_v52 = vadd.f32 %v2945_v29, %v2944_v63  ;;  %v5770_v9 = vadd.f32 %v2880_v18, %v2879_v23 }
 0x900   : > { %v3062_v16 = vpop.xlane.xlu0 %3061 }
 0x901   : > { %v2885_v41 = vrot.slane %v2884_v46, 2  ;;  %v3076_v7 = vrot.slane %v3075_v17, 4  ;;  %v2947_v11 = vrot.slane %v2946_v52, 1 }
 0x902   : > { %v3059_v12 = vpop.xlane.xlu1 %3058 }
 0x903   : > { %v3082_v54 = vadd.f32 %v3062_v16, %v3059_v12  ;;  %v3077_v34 = vadd.f32 %v3076_v7, %v3075_v17  ;;  %v2886_v51 = vadd.f32 %v2885_v41, %v2884_v46  ;;  %v2948_v27 = vadd.f32 %v2947_v11, %v2946_v52  ;;  %v5778_v17 = vpop.eup %4889 }
 0x904   : > { %v2956_v62 = vpop.xlane.xlu0 %2955  ;;  %v3001_v41 = vsub.f32 %v5770_v9, %v5775_v28  ;;  %v5785_v37 = vpop.eup %4891 }
 0x905   : > { %v3083_v8 = vrot.slane %v3082_v54, 4  ;;  %v2967_v56 = vsel %vm2966_vm14, %v2956_v62, 0.0  ;;  %v3078_v25 = vrot.slane %v3077_v34, 2  ;;  %v2887_v5 = vrot.slane %v2886_v51, 1 }
 0x906   : > { %v2959_v19 = vpop.xlane.xlu1 %2958  ;;  %v2968_v22 = vrot.slane %v2967_v56, 4  ;;  %v2998_v52 = vmul.f32 2.0, %v2948_v27 }
 0x907   : > { %v3084_v1 = vadd.f32 %v3083_v8, %v3082_v54  ;;  %v2974_v40 = vsel %vm2966_vm14, %v2959_v19, 0.0  ;;  %v3079_v55 = vadd.f32 %v3078_v25, %v3077_v34  ;;  %v5780_v49 = vadd.f32 %v2887_v5, %v2886_v51 }
 0x908   : > { %v3171_v26 = vpop.f32.mrf.mxu0  ;;  %v2962_v57 = vpop.xlane.xlu0 %2961  ;;  %v2969_v59 = vadd.f32 %v2968_v22, %v2967_v56  ;;  %v2975_v10 = vrot.slane %v2974_v40, 4 }
 0x909   : > { %v3085_v63 = vrot.slane %v3084_v1, 2  ;;  %v2981_v4 = vsel %vm2966_vm14, %v2962_v57, 0.0  ;;  %v3080_v62 = vrot.slane %v3079_v55, 1  ;;  %v3315_v44 = vmul.f32 %v5785_v37, %v3171_v26  ;;  %v5789_v22 = vpop.eup %4893 }
 0x90a   : > { %v4674_v15 = vpop.f32.mrf.mxu0  ;;  %v2965_v33 = vpop.xlane.xlu1 %2964  ;;  %v2970_v36 = vrot.slane %v2969_v59, 2  ;;  %v2976_v35 = vadd.f32 %v2975_v10, %v2974_v40  ;;  %v2982_v30 = vrot.slane %v2981_v4, 4 }
 0x90b   : > { %v3217_v14 = vpop.f32.mrf.mxu1  ;;  %v2988_v38 = vsel %vm2966_vm14, %v2965_v33, 0.0  ;;  %v3086_v7 = vadd.f32 %v3085_v63, %v3084_v1  ;;  %v3002_v1 = vsub.f32 %v5780_v49, %v2998_v52  ;;  %v5791_v26 = vpop.eup %4895 }
 0x90c   : > { %v3174_v29 = vpop.f32.mrf.mxu0  ;;  %v3065_v46 = vpop.xlane.xlu0 %3064  ;;  %v2971_v61 = vadd.f32 %v2970_v36, %v2969_v59  ;;  %v2977_v16 = vrot.slane %v2976_v35, 2  ;;  %v2989_v24 = vrot.slane %v2988_v38, 4  ;;  %v2983_v43 = vadd.f32 %v2982_v30, %v2981_v4 }
 0x90d   : > { %v4680_v50 = vpop.f32.mrf.mxu1  ;;  %v3316_v3 = vmul.f32 %v5778_v17, %v3217_v14  ;;  %v3087_v6 = vrot.slane %v3086_v7, 1  ;;  %v3081_v29 = vadd.f32 %v3080_v62, %v3079_v55 }
 0x90e   : > { %v4675_v23 = vpop.f32.mrf.mxu0  ;;  %v3068_v12 = vpop.xlane.xlu1 %3067  ;;  %v2972_v54 = vrot.slane %v2971_v61, 1  ;;  %v2978_v60 = vadd.f32 %v2977_v16, %v2976_v35  ;;  %v2990_v39 = vadd.f32 %v2989_v24, %v2988_v38  ;;  %v2984_v51 = vrot.slane %v2983_v43, 2 }
 0x90f   : > { %v3220_v34 = vpop.f32.mrf.mxu1  ;;  %v3089_v8 = vadd.f32 %v3068_v12, %v3065_v46  ;;  %v4272_v25 = vpack.c.bf16 %v3316_v3, %v3315_v44  ;;  %v3088_v16 = vadd.f32 %v3087_v6, %v3086_v7 }
 0x910   : > { %v3263_v45 = vpop.f32.mrf.mxu0  ;;  %v2973_v18 = vadd.f32 %v2972_v54, %v2971_v61  ;;  %v2979_v56 = vrot.slane %v2978_v60, 1  ;;  %v2991_v19 = vrot.slane %v2990_v39, 2  ;;  %v3071_v13 = vpop.xlane.xlu0 %3070  ;;  %v2985_v48 = vadd.f32 %v2984_v51, %v2983_v43 }
 0x911   : > { %v4681_v11 = vpop.f32.mrf.mxu1  ;;  %v3090_v40 = vrot.slane %v3089_v8, 4  ;;  %v3317_v33 = vmul.f32 %v5789_v22, %v3263_v45  ;;  %v3420_v23 = vrot.slane %v4272_v25, %v5509_v20  ;;  %v4061_v25 = vsel %vm4041_vm15, %v3081_v29, 0.0 }
 0x912   : > { %v4686_v57 = vpop.f32.mrf.mxu0  ;;  %v3074_v53 = vpop.xlane.xlu1 %3073  ;;  %v3003_v5 = vadd.f32 %v2999_v47, %v2973_v18  ;;  %v2980_v59 = vadd.f32 %v2979_v56, %v2978_v60  ;;  %v2992_v10 = vadd.f32 %v2991_v19, %v2990_v39  ;;  %v2986_v4 = vrot.slane %v2985_v48, 1 }
 0x913   : > { %v3096_v9 = vadd.f32 %v3074_v53, %v3071_v13  ;;  %v3309_v63 = vpop.f32.mrf.mxu1  ;;  %v3091_v15 = vadd.f32 %v3090_v40, %v3089_v8  ;;  %v4062_v19 = vsel %vm4041_vm15, %v3088_v16, 0.0  ;;  %v4277_v16 = vld [vmem:[%s5934_s14] ss:$0 sm:$0xff] }
 0x914   : > { %v3318_v27 = vmul.f32 %v5791_v26, %v3309_v63  ;;  %v3266_v36 = vpop.f32.mrf.mxu0  ;;  %v3007_v35 = vmax.f32 %v3003_v5, 0.0  ;;  %v3004_v14 = vadd.f32 %v3000_v58, %v2980_v59  ;;  %v2993_v28 = vrot.slane %v2992_v10, 1 }
 0x915   : > { %v3097_v30 = vrot.slane %v3096_v9, 4  ;;  %v4692_v38 = vpop.f32.mrf.mxu1  ;;  %v2987_v46 = vadd.f32 %v2986_v4, %v2985_v48  ;;  %v3092_v49 = vrot.slane %v3091_v15, 2  ;;  %v4063_v57 = vadd.f32 %v4062_v19, %v4061_v25  ;;  %v4812_v25 = vld [vmem:[%s5936_s16] sm:$0xff]  }
 0x916   : > { %v4273_v47 = vpack.c.bf16 %v3318_v27, %v3317_v33  ;;  %v4687_v61 = vpop.f32.mrf.mxu0  ;;  %v3008_v24 = vmax.f32 %v3004_v14, 0.0  ;;  %v2994_v50 = vadd.f32 %v2993_v28, %v2992_v10  ;;  %v4042_v55 = vsel %vm4041_vm15, %v3007_v35, 0.0 }
 0x917   : > { %v3098_v43 = vadd.f32 %v3097_v30, %v3096_v9  ;;  %v3312_v3 = vpop.f32.mrf.mxu1  ;;  %v3093_v12 = vadd.f32 %v3092_v49, %v3091_v15  ;;  %v3005_v58 = vadd.f32 %v3001_v41, %v2987_v46 }
 0x918   : > { %v3427_v52 = vrot.slane %v4273_v47, %v5509_v20  ;;  %v3401_v54 = vpop.f32.mrf.mxu0  ;;  %v3006_v34 = vadd.f32 %v3002_v1, %v2994_v50  ;;  %v4043_v62 = vsel %vm4041_vm15, %v3008_v24, 0.0 }
 0x919   : > { %v3099_v60 = vrot.slane %v3098_v43, 2  ;;  %v4693_v39 = vpop.f32.mrf.mxu1  ;;  %v3094_v44 = vrot.slane %v3093_v12, 1  ;;  %v3009_v8 = vmax.f32 %v3005_v58, 0.0  ;;  %v4044_v45 = vadd.f32 %v4043_v62, %v4042_v55 }
 0x91a   : > { %v3428_v7 = vcombine.low %v3420_v23, %v3427_v52  ;;  %v4700_v51 = vpop.f32.mrf.mxu0  ;;  %v3010_v56 = vmax.f32 %v3006_v34, 0.0 }
 0x91b   : > { %v3100_v18 = vadd.f32 %v3099_v60, %v3098_v43  ;;  %v4045_v41 = vsel %vm4041_vm15, %v3009_v8, 0.0  ;;  %v3095_v11 = vadd.f32 %v3094_v44, %v3093_v12 }
 0x91c   : > { %4707 = vmatmul.mubr.msk.bf16.vlgmr.msra.gmra.mxu1 %vm1406_vm12, %v3428_v7  ;;  %v3404_v13 = vpop.f32.mrf.mxu0  ;;  %v4046_v1 = vadd.f32 %v4045_v41, %v4044_v45  ;;  %v4047_v6 = vsel %vm4041_vm15, %v3010_v56, 0.0  ;;  %v4039_v7 = vand.u32 127, %v676_v32 }
 0x91d   : > { %v3101_v48 = vrot.slane %v3100_v18, 1  ;;  %4718 = vmatprep.mubr.msk.bf16.mxu1 %vm4921_vm0, %v4920_v0  ;;  %v4064_v53 = vsel %vm4041_vm15, %v3095_v11, 0.0 }
 0x91e   : > { %v4701_v40 = vpop.f32.mrf.mxu0  ;;  %v4048_v5 = vadd.f32 %v4047_v6, %v4046_v1  ;;  %v4065_v10 = vadd.f32 %v4064_v53, %v4063_v57  ;;  %vm4040_vm1 = vcmp.eq.s32.totalorder %v4039_v7, 0  ;;  %vm4060_vm4 = vcmp.eq.s32.totalorder %v4039_v7, 1  ;;  %v4809_v1 = vld [vmem:[%s5936_s16 + $0x18] sm:$0xff]  }
 0x91f   : > { %v3102_v59 = vadd.f32 %v3101_v48, %v3100_v18 }
 0x920   : > { %4049 = vadd.xlane.f32.xlu0 %v4048_v5 }
 0x921   : > { %v4066_v9 = vsel %vm4041_vm15, %v3102_v59, 0.0 }
 0x922   : > { %v4067_v63 = vadd.f32 %v4066_v9, %v4065_v10 }
 0x924   : > { %4068 = vadd.xlane.f32.xlu1 %v4067_v63 }
 0x9a9   : > { %v4050_v4 = vpop.xlane.xlu0 %4049 }
 0x9aa   : > { %v4051_v15 = vrot.slane %v4050_v4, 4 }
 0x9ac   : > { %v4052_v33 = vadd.f32 %v4051_v15, %v4050_v4 }
 0x9ad   : > { %v4069_v27 = vpop.xlane.xlu1 %4068 }
 0x9ae   : > { %v4070_v36 = vrot.slane %v4069_v27, 4  ;;  %v4053_v35 = vrot.slane %v4052_v33, 2 }
 0x9b0   : > { %v4071_v14 = vadd.f32 %v4070_v36, %v4069_v27  ;;  %v4054_v28 = vadd.f32 %v4053_v35, %v4052_v33 }
 0x9b2   : > { %v4072_v30 = vrot.slane %v4071_v14, 2  ;;  %v4055_v38 = vrot.slane %v4054_v28, 1 }
 0x9b4   : > { %v4073_v29 = vadd.f32 %v4072_v30, %v4071_v14  ;;  %v4056_v46 = vadd.f32 %v4055_v38, %v4054_v28 }
 0x9b6   : > { %v4074_v49 = vrot.slane %v4073_v29, 1  ;;  %4772 = vpush %v4056_v46 }
 0x9b8   : > { %v4075_v47 = vadd.f32 %v4074_v49, %v4073_v29 }
 0x9ba   : > { %4774 = vpush %v4075_v47 }
 0x9dc   : > { %v3478_v61 = vpop.f32.mrf.mxu1 }
 0x9dd   : > { %v3479_v24 = vadd.f32 %v3478_v61, %v3401_v54 }
 0x9de   : > { %v4708_v50 = vpop.f32.mrf.mxu1 }
 0x9df   : > { %v3492_v43 = vadd.f32 %v4277_v16, %v3479_v24 }
 0x9e0   : > { %v3481_v3 = vpop.f32.mrf.mxu1 }
 0x9e1   : > { %v3496_v23 = vcombine.high %v3492_v43, %v3492_v43  ;;  %v3500_v12 = vmax.f32 %v3492_v43, 0.0  ;;  %v3482_v52 = vadd.f32 %v3481_v3, %v3404_v13 }
 0x9e2   : > { %v4709_v58 = vpop.f32.mrf.mxu1 }
 0x9e3   : > { %v3501_v60 = vmax.f32 %v3496_v23, 0.0  ;;  %v3493_v39 = vadd.f32 %v4277_v16, %v3482_v52  ;;  %v3504_v34 = vpack.c.bf16 %v3500_v12, %v3500_v12 }
 0x9e5   : > { %v3497_v55 = vcombine.high %v3493_v39, %v3493_v39  ;;  %v3502_v62 = vmax.f32 %v3493_v39, 0.0  ;;  %v3509_v44 = vsel %vm1026_vm2, %v3504_v34, 0  ;;  %v3505_v54 = vpack.c.bf16 %v3501_v60, %v3501_v60  ;;  %v4820_v39 = vld [vmem:[%s5938_s18] sm:$0xff]  }
 0x9e6   : > { %4711 = vmatpush3.bf16.msra.mxu0 %v3509_v44  ;;  %v4282_v48 = vpack.c.bf16 %v3501_v60, %v3500_v12 }
 0x9e7   : > { %v3503_v51 = vmax.f32 %v3497_v55, 0.0  ;;  %4722 = vmatprep.subr.bf16.mxu0 %v4920_v0  ;;  %v3506_v8 = vpack.c.bf16 %v3502_v62, %v3502_v62  ;;  %s4773_s4 = spop %4772  ;;  %v3552_v45 = vsel %vm1026_vm2, %v3505_v54, 0  ;;  %v4296_v55 = vld [vmem:[%s5937_s17] ss:$0 sm:$0xff] }
 0x9e8   : > { %4717 = vmatpush3.bf16.msra.mxu1 %v3552_v45  ;;  %v4058_v32 = vstv %s4773_s4 }
 0x9e9   : > { %4713 = vmatmul.mubr.msk.bf16.vlgmr.msra.gmra.mxu0 %vm1013_vm3, %v5603_v2  ;;  %v3595_v18 = vsel %vm1026_vm2, %v3506_v8, 0  ;;  %v3507_v56 = vpack.c.bf16 %v3503_v51, %v3503_v51  ;;  %4728 = vmatprep.subr.bf16.mxu1 %v4920_v0  ;;  %v4059_v13 = vsel %vm4040_vm1, %v4058_v32, 0.0  ;;  %v4283_v6 = vpack.c.bf16 %v3503_v51, %v3502_v62 }
 0x9ea   : > { %4723 = vmatpush3.bf16.msra.mxu0 %v3595_v18  ;;  %4724 = vmatprep.mubr.msk.bf16.mxu0 %vm4921_vm0, %v4920_v0 }
 0x9eb   : > { %v3638_v19 = vsel %vm1026_vm2, %v3507_v56, 0  ;;  %s4775_s30 = spop %4774  ;;  %4734 = vmatprep.subr.bf16.mxu0 %v4920_v0  ;;  %4719 = vmatmul.mubr.msk.bf16.vlgmr.msra.gmra.mxu1 %vm1013_vm3, %v5606_v42  ;;  %v4810_v42 = vld [vmem:[%s5936_s16 + $0x10] sm:$0xff]   ;;  %v3723_v40 = vrot.slane %v4283_v6, %v5509_v20  ;;  %vm3749_vm2 = vcmask 523264  }
 0x9ec   : > { %v4077_v2 = vstv %s4775_s30  ;;  %4729 = vmatpush3.bf16.msra.mxu1 %v3638_v19  ;;  %4730 = vmatprep.mubr.msk.bf16.mxu1 %vm4921_vm0, %v4920_v0  ;;  %s5958_s30 = sld [smem:[#allocation11_spill]] }
 0x9ed   : > { %v4078_v41 = vsel %vm4060_vm4, %v4077_v2, 0.0  ;;  %4746 = vmatprep.subr.bf16.mxu1 %v4920_v0 }
 0x9ee   : > { %v4079_v11 = vadd.f32 %v4078_v41, %v4059_v13 }
 0x9f0   : > { %4080 = vst [vmem:[%s673_s23] sm:$0x1] %v4079_v11 }
 0x9f1   : > { %4725 = vmatmul.mubr.msk.bf16.vlgmr.msra.gmra.mxu0 %vm1013_vm3, %v5626_v21  ;;  %v4811_v21 = vld [vmem:[%s5936_s16 + $0x8] sm:$0xff]  }
 0x9f2   : > { %4735 = vmatpush3.bf16.msra.mxu0 %v4809_v1  ;;  %4742 = vmatprep.mubr.msk.bf16.mxu0 %vm4921_vm0, %v4920_v0  ;;  %v4813_v53 = vld [vmem:[%s5958_s30 + $0x18] sm:$0xff]   ;;  %v4814_v5 = vld [vmem:[%s5958_s30 + $0x10] sm:$0xff]   ;;  %v4815_v59 = vld [vmem:[%s5958_s30 + $0x8] sm:$0xff]  }
 0x9f3   : > { %4736 = vmatprep.subr.bf16.mxu0 %v4920_v0  ;;  %4731 = vmatmul.mubr.msk.bf16.vlgmr.msra.gmra.mxu1 %vm1013_vm3, %v5631_v31  ;;  %v3716_v31 = vrot.slane %v4282_v48, %v5509_v20  ;;  %v4816_v10 = vld [vmem:[%s5958_s30] sm:$0xff]   ;;  %vm3963_vm3 = vcmask 1041409  }
 0x9f4   : > { %4754 = vmatprep.mubr.msk.bf16.mxu1 %vm4921_vm0, %v4920_v0  ;;  %4747 = vmatpush3.bf16.msra.mxu1 %v4813_v53 }
 0x9f5   : > { %v3724_v57 = vcombine.low %v3716_v31, %v3723_v40  ;;  %4748 = vmatprep.subr.bf16.mxu1 %v4920_v0 }
 0x9f6   : > { %4737 = vmatpush3.bf16.msra.mxu0 %v4810_v42 }
 0x9f7   : > { %4738 = vmatprep.subr.bf16.mxu0 %v4920_v0 }
 0x9f8   : > { %4749 = vmatpush3.bf16.msra.mxu1 %v4814_v5 }
 0x9f9   : > { %4750 = vmatprep.subr.bf16.mxu1 %v4920_v0 }
 0x9fa   : > { %4739 = vmatpush3.bf16.msra.mxu0 %v4811_v21 }
 0x9fb   : > { %4740 = vmatprep.subr.bf16.mxu0 %v4920_v0 }
 0x9fc   : > { %4751 = vmatpush3.bf16.msra.mxu1 %v4815_v59 }
 0x9fd   : > { %4752 = vmatprep.subr.bf16.mxu1 %v4920_v0 }
 0x9fe   : > { %4741 = vmatpush3.bf16.msra.mxu0 %v4812_v25 }
 0x9ff   : > { %4758 = vmatprep.subr.bf16.mxu0 %v4920_v0 }
 0xa00   : > { %4753 = vmatpush3.bf16.msra.mxu1 %v4816_v10 }
 0xa01   : > { %4743 = vmatmul.mubr.msk.bf16.vlgmr.msra.gmra.mxu0 %vm3749_vm2, %v3724_v57 }
 0xa02   : > { %4766 = vmatprep.mubr.msk.bf16.mxu0 %vm4921_vm0, %v4920_v0  ;;  %vm3902_vm0 = vcmask 519168  }
 0xaa9   : > { %v3545_v9 = vpop.f32.mrf.mxu0 }
 0xaaa   : > { %v3680_v30 = vmul.f32 %v5785_v37, %v3545_v9 }
 0xaab   : > { %v4714_v63 = vpop.f32.mrf.mxu0  ;;  %v3588_v4 = vpop.f32.mrf.mxu1 }
 0xaac   : > { %v3681_v35 = vmul.f32 %v5778_v17, %v3588_v4 }
 0xaad   : > { %v3548_v15 = vpop.f32.mrf.mxu0  ;;  %v4720_v33 = vpop.f32.mrf.mxu1 }
 0xaae   : > { %v4289_v46 = vpack.c.bf16 %v3681_v35, %v3680_v30 }
 0xaaf   : > { %v4715_v27 = vpop.f32.mrf.mxu0  ;;  %v3591_v36 = vpop.f32.mrf.mxu1 }
 0xab0   : > { %v3806_v3 = vrot.slane %v4289_v46, %v5509_v20 }
 0xab1   : > { %v3631_v14 = vpop.f32.mrf.mxu0  ;;  %v4721_v28 = vpop.f32.mrf.mxu1 }
 0xab2   : > { %v3682_v49 = vmul.f32 %v5789_v22, %v3631_v14  ;;  %v4817_v22 = vld [vmem:[%s5938_s18 + $0x18] sm:$0xff]  }
 0xab3   : > { %v4726_v38 = vpop.f32.mrf.mxu0  ;;  %v3674_v29 = vpop.f32.mrf.mxu1  ;;  %4759 = vmatpush3.bf16.msra.mxu0 %v4817_v22 }
 0xab4   : > { %v3683_v47 = vmul.f32 %v5791_v26, %v3674_v29  ;;  %4760 = vmatprep.subr.bf16.mxu0 %v4920_v0  ;;  %v4818_v26 = vld [vmem:[%s5938_s18 + $0x10] sm:$0xff]  }
 0xab5   : > { %v3634_v61 = vpop.f32.mrf.mxu0  ;;  %v4732_v16 = vpop.f32.mrf.mxu1 }
 0xab6   : > { %v4290_v24 = vpack.c.bf16 %v3683_v47, %v3682_v49 }
 0xab7   : > { %v4727_v50 = vpop.f32.mrf.mxu0  ;;  %v3677_v43 = vpop.f32.mrf.mxu1  ;;  %4761 = vmatpush3.bf16.msra.mxu0 %v4818_v26 }
 0xab8   : > { %v3813_v17 = vrot.slane %v4290_v24, %v5509_v20  ;;  %4762 = vmatprep.subr.bf16.mxu0 %v4920_v0  ;;  %v4819_v20 = vld [vmem:[%s5938_s18 + $0x8] sm:$0xff]  }
 0xab9   : > { %v4733_v23 = vpop.f32.mrf.mxu1 }
 0xaba   : > { %v3814_v12 = vcombine.low %v3806_v3, %v3813_v17 }
 0xabb   : > { %4763 = vmatpush3.bf16.msra.mxu0 %v4819_v20 }
 0xabc   : > { %4755 = vmatmul.mubr.msk.bf16.vlgmr.msra.gmra.mxu1 %vm3749_vm2, %v3814_v12  ;;  %4764 = vmatprep.subr.bf16.mxu0 %v4920_v0 }
 0xabf   : > { %4765 = vmatpush3.bf16.msra.mxu0 %v4820_v39 }
 0xac1   : > { %v3787_v37 = vpop.f32.mrf.mxu0 }
 0xac3   : > { %v4744_v52 = vpop.f32.mrf.mxu0 }
 0xac5   : > { %v3790_v58 = vpop.f32.mrf.mxu0 }
 0xac7   : > { %v4745_v60 = vpop.f32.mrf.mxu0 }
 0xac8   : > { %v4297_v60 = vld [vmem:[%s5939_s19] ss:$0 sm:$0xff] }
 0xb7c   : > { %v3876_v34 = vpop.f32.mrf.mxu1 }
 0xb7d   : > { %v3877_v62 = vadd.f32 %v3876_v34, %v3787_v37 }
 0xb7e   : > { %v4756_v44 = vpop.f32.mrf.mxu1 }
 0xb7f   : > { %v3890_v7 = vadd.f32 %v4296_v55, %v3877_v62 }
 0xb80   : > { %v3879_v54 = vpop.f32.mrf.mxu1 }
 0xb81   : > { %v3894_v51 = vcombine.high %v3890_v7, %v3890_v7  ;;  %v3898_v8 = vmax.f32 %v3890_v7, 0.0  ;;  %v3880_v45 = vadd.f32 %v3879_v54, %v3790_v58 }
 0xb82   : > { %v4757_v18 = vpop.f32.mrf.mxu1 }
 0xb83   : > { %v3899_v0 = vmax.f32 %v3894_v51, 0.0  ;;  %v3903_v56 = vsel %vm3902_vm0, %v3898_v8, 0.0  ;;  %v3891_v32 = vadd.f32 %v4296_v55, %v3880_v45 }
 0xb84   : > { %v3904_v19 = vrot.slane %v3903_v56, 4 }
 0xb85   : > { %v3910_v2 = vsel %vm3902_vm0, %v3899_v0, 0.0  ;;  %v3895_v13 = vcombine.high %v3891_v32, %v3891_v32  ;;  %v3900_v41 = vmax.f32 %v3891_v32, 0.0 }
 0xb86   : > { %v3905_v11 = vadd.f32 %v3904_v19, %v3903_v56  ;;  %v3911_v1 = vrot.slane %v3910_v2, 4 }
 0xb87   : > { %v3901_v42 = vmax.f32 %v3895_v13, 0.0  ;;  %v3917_v21 = vsel %vm3902_vm0, %v3900_v41, 0.0 }
 0xb88   : > { %v3906_v6 = vrot.slane %v3905_v11, 2  ;;  %v3912_v48 = vadd.f32 %v3911_v1, %v3910_v2  ;;  %v3918_v25 = vrot.slane %v3917_v21, 4 }
 0xb89   : > { %v3924_v40 = vsel %vm3902_vm0, %v3901_v42, 0.0 }
 0xb8a   : > { %v3907_v31 = vadd.f32 %v3906_v6, %v3905_v11  ;;  %v3913_v57 = vrot.slane %v3912_v48, 2  ;;  %v3919_v53 = vadd.f32 %v3918_v25, %v3917_v21  ;;  %v3925_v5 = vrot.slane %v3924_v40, 4 }
 0xb8c   : > { %v3908_v59 = vrot.slane %v3907_v31, 1  ;;  %v3914_v10 = vadd.f32 %v3913_v57, %v3912_v48  ;;  %v3920_v9 = vrot.slane %v3919_v53, 2  ;;  %v3926_v63 = vadd.f32 %v3925_v5, %v3924_v40 }
 0xb8e   : > { %v3909_v4 = vadd.f32 %v3908_v59, %v3907_v31  ;;  %v3915_v15 = vrot.slane %v3914_v10, 1  ;;  %v3921_v33 = vadd.f32 %v3920_v9, %v3919_v53  ;;  %v3927_v27 = vrot.slane %v3926_v63, 2 }
 0xb90   : > { %v3916_v36 = vadd.f32 %v3915_v15, %v3914_v10  ;;  %v3932_v35 = vmul.f32 0.25, %v3909_v4  ;;  %v3922_v14 = vrot.slane %v3921_v33, 1  ;;  %v3928_v28 = vadd.f32 %v3927_v27, %v3926_v63 }
 0xb92   : > { %v3933_v30 = vmul.f32 0.25, %v3916_v36  ;;  %v3936_v38 = vpack.c.bf16 %v3932_v35, %v3932_v35  ;;  %v3923_v29 = vadd.f32 %v3922_v14, %v3921_v33  ;;  %v3929_v46 = vrot.slane %v3928_v28, 1 }
 0xb94   : > { %v3937_v49 = vpack.c.bf16 %v3933_v30, %v3933_v30  ;;  %v3930_v47 = vadd.f32 %v3929_v46, %v3928_v28  ;;  %v3934_v61 = vmul.f32 0.25, %v3923_v29  ;;  %v3959_v16 = vunpack.c.l.b16 %v3936_v38 }
 0xb96   : > { %v3960_v24 = vunpack.c.l.b16 %v3937_v49  ;;  %v3935_v50 = vmul.f32 0.25, %v3930_v47  ;;  %v3938_v43 = vpack.c.bf16 %v3934_v61, %v3934_v61 }
 0xb98   : > { %v3939_v3 = vpack.c.bf16 %v3935_v50, %v3935_v50  ;;  %v3961_v17 = vunpack.c.l.b16 %v3938_v43  ;;  %v3964_v23 = vsel %vm3963_vm3, %v3960_v24, %v3959_v16 }
 0xb9a   : > { %v3962_v12 = vunpack.c.l.b16 %v3939_v3  ;;  %v3966_v37 = vsel %vm3965_vm5, %v3961_v17, %v3964_v23 }
 0xb9c   : > { %v3968_v52 = vsel %vm3967_vm6, %v3962_v12, %v3966_v37 }
 0xb9d   : > { %v3969_v58 = vpack.c.b16 %v3968_v52, %v3968_v52 }
 0xb9f   : > { %4767 = vmatmul.mubr.msk.bf16.vlgmr.msra.gmra.mxu0 %vm3749_vm2, %v3969_v58 }
 0xc5f   : > { %v4031_v22 = vpop.f32.mrf.mxu0 }
 0xc60   : > { %v4032_v26 = vadd.f32 %v4297_v60, %v4031_v22 }
 0xc61   : > { %v4768_v20 = vpop.f32.mrf.mxu0 }
 0xc62   : > { %4037 = vst [vmem:[%s670_s27] sm:$0xf] %v4032_v26 }
 0xc63   : > { %v4034_v39 = vpop.f32.mrf.mxu0 }
 0xc65   : > { %v4769_v34 = vpop.f32.mrf.mxu0 }
 0xc66 PF: > { %s38_s28 = sadd.s32 1, %s4917_s28  }
 0xc67   : > { %p35_p10 = scmp.ge.s32.totalorder %s38_s28, 4  }
 0xc69   :  { %37 = sbr.rel (!%p35_p10) target bundleno = 29 (0x1d), region = 141 }

</bundles_post_ra>
